<compile_context>
chip_gen: v7x
topology: tpu7x:2x2x1
jax: 0.10.0
libtpu: 0.0.40
codegen_flags: <defaults>
</compile_context>

<pallas_src>
import functools
import math

import jax
import jax.numpy as jnp
import numpy as np
from jax.experimental import pallas as pl
from jax.experimental.pallas import tpu as pltpu


# ---------------------- Vikl_Fusion_OriVersion hyper-parameters ----------------------
_T_NTXENT = 0.7
_LS_NTXENT = 0.2
_T_HARD = 0.8
_TAU_PLUS = 0.1
_BETA = 1.0


# --------------------------------- kernel helpers ------------------------------------

def _mm_t(a, b, scale):
    """a @ b.T * scale on the MXU with f32 accumulation."""
    return jax.lax.dot_general(
        a, b, (((1,), (1,)), ((), ())),
        preferred_element_type=jnp.float32) * scale


def _nt_xent_pair(x, y, temperature, label_smoothing):
    """NT-Xent (SimCLR) loss with label smoothing on the pair (x, y), block form, no masks."""
    b = x.shape[0]
    n = 2 * b
    k = n - 1
    eps = label_smoothing
    inv_t = 1.0 / temperature

    # cosine normalization (clamp ~ torch CosineSimilarity eps=1e-8 on the norm)
    xn = x * jax.lax.rsqrt(jnp.maximum(jnp.sum(x * x, -1, keepdims=True), 1e-16))
    yn = y * jax.lax.rsqrt(jnp.maximum(jnp.sum(y * y, -1, keepdims=True), 1e-16))

    a11 = _mm_t(xn, xn, inv_t)
    a12 = _mm_t(xn, yn, inv_t)
    a21 = _mm_t(yn, xn, inv_t)   # == a12.T; extra tiny matmul avoids an XLU transpose
    a22 = _mm_t(yn, yn, inv_t)

    d11 = jnp.sum(xn * xn, -1, keepdims=True) * inv_t   # diag(a11)
    d22 = jnp.sum(yn * yn, -1, keepdims=True) * inv_t   # diag(a22)
    pos = jnp.sum(xn * yn, -1, keepdims=True) * inv_t   # diag(a12) == diag(a21)

    # full-row sums; negatives recovered algebraically (no NxN iota masks / where temporaries)
    rs1 = jnp.sum(a11, -1, keepdims=True) + jnp.sum(a12, -1, keepdims=True)
    rs2 = jnp.sum(a21, -1, keepdims=True) + jnp.sum(a22, -1, keepdims=True)
    es1 = jnp.sum(jnp.exp(a11), -1, keepdims=True) + jnp.sum(jnp.exp(a12), -1, keepdims=True)
    es2 = jnp.sum(jnp.exp(a21), -1, keepdims=True) + jnp.sum(jnp.exp(a22), -1, keepdims=True)

    neg1 = rs1 - d11 - pos
    neg2 = rs2 - d22 - pos
    # logsumexp over [pos, negatives] == log(full exp row sum - exp(diag)); cosine sim is
    # bounded by 1/temperature after normalization, so no max-subtraction is needed.
    lse1 = jnp.log(es1 - jnp.exp(d11))
    lse2 = jnp.log(es2 - jnp.exp(d22))

    l1 = lse1 - (1.0 - eps) * pos - (eps / k) * (pos + neg1)
    l2 = lse2 - (1.0 - eps) * pos - (eps / k) * (pos + neg2)
    return (jnp.sum(l1) + jnp.sum(l2)) / n


def _hard_negative_pair(x, y, temperature, tau_plus, beta):
    """Debiased hard-negative contrastive loss ('hard' estimator), block form, no masks."""
    b = x.shape[0]
    n = 2 * b
    nn = n - 2
    inv_t = 1.0 / temperature

    # TODO(synk): exp(dot/T) of un-normalized embeddings can overflow f32; the torch
    # reference has the same behaviour (no max-subtraction), kept for bit-compatibility.
    e11 = jnp.exp(_mm_t(x, x, inv_t))
    e12 = jnp.exp(_mm_t(x, y, inv_t))
    e21 = jnp.exp(_mm_t(y, x, inv_t))
    e22 = jnp.exp(_mm_t(y, y, inv_t))

    d11 = jnp.exp(jnp.sum(x * x, -1, keepdims=True) * inv_t)   # exp(diag), first half
    d22 = jnp.exp(jnp.sum(y * y, -1, keepdims=True) * inv_t)   # exp(diag), second half
    pos = jnp.exp(jnp.sum(x * y, -1, keepdims=True) * inv_t)   # exp(pair) == torch `pos`

    # sum of exp over the 2B-2 negatives of every row (drop diag + positive pair)
    s1 = jnp.sum(e11, -1, keepdims=True) + jnp.sum(e12, -1, keepdims=True) - d11 - pos
    s2 = jnp.sum(e21, -1, keepdims=True) + jnp.sum(e22, -1, keepdims=True) - d22 - pos

    if beta == 1.0:
        # imp == neg  =>  sum(imp) = s,  sum(imp*neg) = sum(neg^2): no second exp pass.
        i1, i2 = s1, s2
        q1 = (jnp.sum(e11 * e11, -1, keepdims=True) + jnp.sum(e12 * e12, -1, keepdims=True)
              - d11 * d11 - pos * pos)
        q2 = (jnp.sum(e21 * e21, -1, keepdims=True) + jnp.sum(e22 * e22, -1, keepdims=True)
              - d22 * d22 - pos * pos)
    else:  # general beta: imp = neg ** beta
        p11, p12, p21, p22 = e11 ** beta, e12 ** beta, e21 ** beta, e22 ** beta
        pd11, pd22, ppos = d11 ** beta, d22 ** beta, pos ** beta
        i1 = jnp.sum(p11, -1, keepdims=True) + jnp.sum(p12, -1, keepdims=True) - pd11 - ppos
        i2 = jnp.sum(p21, -1, keepdims=True) + jnp.sum(p22, -1, keepdims=True) - pd22 - ppos
        q1 = (jnp.sum(p11 * e11, -1, keepdims=True) + jnp.sum(p12 * e12, -1, keepdims=True)
              - pd11 * d11 - ppos * pos)
        q2 = (jnp.sum(p21 * e21, -1, keepdims=True) + jnp.sum(p22 * e22, -1, keepdims=True)
              - pd22 * d22 - ppos * pos)

    rw1 = q1 * nn / i1
    rw2 = q2 * nn / i2
    ng1 = (-tau_plus * nn * pos + rw1) / (1.0 - tau_plus)
    ng2 = (-tau_plus * nn * pos + rw2) / (1.0 - tau_plus)
    floor = nn * math.exp(-1.0 / temperature)   # temperature is a static Python float
    ng1 = jnp.maximum(ng1, floor)
    ng2 = jnp.maximum(ng2, floor)

    l1 = -jnp.log(pos / (pos + ng1))
    l2 = -jnp.log(pos / (pos + ng2))
    return (jnp.sum(l1) + jnp.sum(l2)) / n


# ----------------------------------- fused kernel ------------------------------------

def _fused_losses_kernel(img1_ref, img2_ref, text_ref, img1a_ref, texta_ref, attra_ref,
                         out_ref):
    """All four loss terms in one invocation; 6 scalars written to SMEM.

    out = [loss_i_t, loss_i_a, loss_t_a, loss_intra_modal, loss_inter_modal, loss_sum]
    """
    img1 = img1_ref[...].astype(jnp.float32)
    img2 = img2_ref[...].astype(jnp.float32)
    text = text_ref[...].astype(jnp.float32)
    img1a = img1a_ref[...].astype(jnp.float32)
    texta = texta_ref[...].astype(jnp.float32)
    attra = attra_ref[...].astype(jnp.float32)

    l_it = _nt_xent_pair(img1, text, _T_NTXENT, _LS_NTXENT)
    l_ia = _hard_negative_pair(img1a, attra, _T_HARD, _TAU_PLUS, _BETA)
    l_ta = _nt_xent_pair(texta, attra, _T_NTXENT, _LS_NTXENT)
    l_ii = _hard_negative_pair(img1, img2, _T_HARD, _TAU_PLUS, _BETA)

    inter = (l_ia + l_it + l_ta) / 3.0
    total = inter + l_ii

    out_ref[0] = l_it
    out_ref[1] = l_ia
    out_ref[2] = l_ta
    out_ref[3] = l_ii
    out_ref[4] = inter
    out_ref[5] = total


# TODO(synk): for production batch sizes (N = 2B >~ 1k) add a row-tiled grid fallback
# (flash-style online reduction over row blocks, 'parallel' row axis for v7x's 2 TCs)
# so the NxN blocks never exceed v7x's 64 MiB VMEM; bf16-casting the normalized
# embeddings before the MXU is the main extra lever on v6e/v7x at real D.
@jax.jit
def _fused_losses(img_z1, img_z2, text_z, attr_z, attr_uni):
    # hoist + share the attr_uni gathers: computed once, fed to both attr losses
    img_z1_a = img_z1[attr_uni, :]
    text_z_a = text_z[attr_uni, :]
    attr_z_a = attr_z[attr_uni, :]

    b = img_z1.shape[0]
    ba = attr_uni.shape[0]
    d = img_z1.shape[1]

    flops = 0
    transc = 0
    for bb in (b, ba, ba, b):          # pairs: (i,t), (i,a), (t,a), (i,i)
        flops += 4 * 2 * bb * bb * d + 64 * bb * bb
        transc += 4 * bb * bb + 8 * bb
    bytes_accessed = 4 * d * (3 * b + 3 * ba) + 6 * 4

    vmem_spec = pl.BlockSpec(memory_space=pltpu.MemorySpace.VMEM)
    out = pl.pallas_call(
        _fused_losses_kernel,
        out_shape=jax.ShapeDtypeStruct((6,), jnp.float32),
        in_specs=[vmem_spec] * 6,
        out_specs=pl.BlockSpec(memory_space=pltpu.MemorySpace.SMEM),
        compiler_params=pltpu.CompilerParams(vmem_limit_bytes=32 * 1024 * 1024),
        cost_estimate=pl.CostEstimate(flops=flops, transcendentals=transc,
                                      bytes_accessed=bytes_accessed),
    )(img_z1, img_z2, text_z, img_z1_a, text_z_a, attr_z_a)
    return out


def vikl_fusion_ori_version(img_z1, img_z2, text_z, attr_z, attr_uni):
    """Pallas implementation of Vikl_Fusion_OriVersion.forward (one launch, one host sync)."""
    out = _fused_losses(img_z1, img_z2, text_z, attr_z, attr_uni)
    loss = out[5]                                   # stays a device scalar (jit-friendly)
    host = np.asarray(jax.device_get(out))          # single device->host transfer for metrics
    met_dict = {
        "loss_i_t": float(host[0]),
        "loss_i_a": float(host[1]),
        "loss_t_a": float(host[2]),
        "loss_intra_modal": float(host[3]),
        "loss_sum": float(host[5]),
    }
    return loss, met_dict


# ------------------------------ pure-JAX reference ------------------------------

def _nt_xent_ref(z_i, z_j, temperature=_T_NTXENT, label_smoothing=_LS_NTXENT):
    b = z_i.shape[0]
    n = 2 * b
    z = jnp.concatenate([z_i, z_j], axis=0)
    zn = z / jnp.linalg.norm(z, axis=-1, keepdims=True)
    sim = (zn @ zn.T) / temperature
    row = jnp.arange(n)[:, None]
    col = jnp.arange(n)[None, :]
    pair = jnp.logical_or(col == row + b, col == row - b)
    negm = jnp.logical_not(jnp.logical_or(col == row, pair))
    pos = jnp.sum(jnp.where(pair, sim, 0.0), axis=-1)
    neg_sum = jnp.sum(jnp.where(negm, sim, 0.0), axis=-1)
    lse = jnp.log(jnp.exp(pos) + jnp.sum(jnp.where(negm, jnp.exp(sim), 0.0), axis=-1))
    k = n - 1
    eps = label_smoothing
    return jnp.sum(lse - (1 - eps) * pos - (eps / k) * (pos + neg_sum)) / n


def _hard_negative_ref(o1, o2, temperature=_T_HARD, tau_plus=_TAU_PLUS, beta=_BETA):
    b = o1.shape[0]
    n = 2 * b
    x = jnp.concatenate([o1, o2], axis=0)
    dot = (x @ x.T) / temperature
    expdot = jnp.exp(dot)
    row = jnp.arange(n)[:, None]
    col = jnp.arange(n)[None, :]
    pair = jnp.logical_or(col == row + b, col == row - b)
    negm = jnp.logical_not(jnp.logical_or(col == row, pair))
    pos = jnp.sum(jnp.where(pair, expdot, 0.0), axis=-1)
    neg = jnp.where(negm, expdot, 0.0)
    imp = jnp.where(negm, jnp.exp(beta * dot), 0.0)
    nn = n - 2
    reweight = jnp.sum(imp * neg, -1) / (jnp.sum(imp, -1) / nn)
    ng = (-tau_plus * nn * pos + reweight) / (1 - tau_plus)
    ng = jnp.maximum(ng, nn * math.exp(-1.0 / temperature))
    return jnp.mean(-jnp.log(pos / (pos + ng)))


# ----------------------------------- main -----------------------------------

if __name__ == "__main__":
    key = jax.random.PRNGKey(0)
    B, D = 8, 32
    k1, k2, k3, k4 = jax.random.split(key, 4)

    def make(k):
        v = jax.random.normal(k, (B, D), dtype=jnp.float32)
        return v / jnp.linalg.norm(v, axis=-1, keepdims=True)

    img_z1 = make(k1)
    img_z2 = make(k2)
    text_z = make(k3)
    attr_z = make(k4)
    # indices of samples that have attribute annotations (subset of the batch)
    attr_uni = jnp.array([0, 1, 3, 4, 6, 7], dtype=jnp.int32)

    loss, met_dict = vikl_fusion_ori_version(img_z1, img_z2, text_z, attr_z, attr_uni)
    loss = jax.block_until_ready(loss)

    ref_it = float(_nt_xent_ref(img_z1, text_z))
    ref_ia = float(_hard_negative_ref(img_z1[attr_uni], attr_z[attr_uni]))
    ref_ta = float(_nt_xent_ref(text_z[attr_uni], attr_z[attr_uni]))
    ref_ii = float(_hard_negative_ref(img_z1, img_z2))
    ref_total = (ref_it + ref_ia + ref_ta) / 3.0 + ref_ii

    checks = [
        ("loss_i_t", met_dict["loss_i_t"], ref_it),
        ("loss_i_a", met_dict["loss_i_a"], ref_ia),
        ("loss_t_a", met_dict["loss_t_a"], ref_ta),
        ("loss_intra_modal", met_dict["loss_intra_modal"], ref_ii),
        ("loss_sum", float(loss), ref_total),
    ]
    for name, got, want in checks:
        assert abs(got - want) < 1e-3 * max(1.0, abs(want)), (name, got, want, met_dict)
    print("KERNEL_OK")
</pallas_src>

<mosaic_0001>
module attributes {stable_mosaic.version = 11 : i64} {
  func.func @_fused_losses_kernel(%arg0: memref<8x32xf32, #tpu.memory_space<vmem>>, %arg1: memref<8x32xf32, #tpu.memory_space<vmem>>, %arg2: memref<8x32xf32, #tpu.memory_space<vmem>>, %arg3: memref<6x32xf32, #tpu.memory_space<vmem>>, %arg4: memref<6x32xf32, #tpu.memory_space<vmem>>, %arg5: memref<6x32xf32, #tpu.memory_space<vmem>>, %arg6: memref<6xf32, #tpu.memory_space<smem>>) attributes {dimension_semantics = [], scalar_prefetch = 0 : i64, scratch_operands = 0 : i64, tpu.core_type = #tpu.core_type<tc>} {
    %c0 = arith.constant 0 : index
    %c0_0 = arith.constant 0 : index
    %0 = vector.load %arg0[%c0, %c0_0] : memref<8x32xf32, #tpu.memory_space<vmem>>, vector<8x32xf32>
    %c0_1 = arith.constant 0 : index
    %c0_2 = arith.constant 0 : index
    %1 = vector.load %arg1[%c0_1, %c0_2] : memref<8x32xf32, #tpu.memory_space<vmem>>, vector<8x32xf32>
    %c0_3 = arith.constant 0 : index
    %c0_4 = arith.constant 0 : index
    %2 = vector.load %arg2[%c0_3, %c0_4] : memref<8x32xf32, #tpu.memory_space<vmem>>, vector<8x32xf32>
    %c0_5 = arith.constant 0 : index
    %c0_6 = arith.constant 0 : index
    %3 = vector.load %arg3[%c0_5, %c0_6] : memref<6x32xf32, #tpu.memory_space<vmem>>, vector<6x32xf32>
    %c0_7 = arith.constant 0 : index
    %c0_8 = arith.constant 0 : index
    %4 = vector.load %arg4[%c0_7, %c0_8] : memref<6x32xf32, #tpu.memory_space<vmem>>, vector<6x32xf32>
    %c0_9 = arith.constant 0 : index
    %c0_10 = arith.constant 0 : index
    %5 = vector.load %arg5[%c0_9, %c0_10] : memref<6x32xf32, #tpu.memory_space<vmem>>, vector<6x32xf32>
    %6 = arith.mulf %0, %0 : vector<8x32xf32>
    %cst = arith.constant dense<0.000000e+00> : vector<8xf32>
    %7 = vector.multi_reduction <add>, %6, %cst [1] : vector<8x32xf32> to vector<8xf32>
    %8 = vector.shape_cast %7 : vector<8xf32> to vector<8x1xf32>
    %cst_11 = arith.constant 1.000000e-16 : f32
    %9 = vector.broadcast %cst_11 : f32 to vector<8x1xf32>
    %10 = arith.maximumf %8, %9 : vector<8x1xf32>
    %11 = math.rsqrt %10 : vector<8x1xf32>
    %12 = vector.broadcast %11 : vector<8x1xf32> to vector<8x32xf32>
    %13 = arith.mulf %0, %12 : vector<8x32xf32>
    %14 = arith.mulf %2, %2 : vector<8x32xf32>
    %cst_12 = arith.constant dense<0.000000e+00> : vector<8xf32>
    %15 = vector.multi_reduction <add>, %14, %cst_12 [1] : vector<8x32xf32> to vector<8xf32>
    %16 = vector.shape_cast %15 : vector<8xf32> to vector<8x1xf32>
    %cst_13 = arith.constant 1.000000e-16 : f32
    %17 = vector.broadcast %cst_13 : f32 to vector<8x1xf32>
    %18 = arith.maximumf %16, %17 : vector<8x1xf32>
    %19 = math.rsqrt %18 : vector<8x1xf32>
    %20 = vector.broadcast %19 : vector<8x1xf32> to vector<8x32xf32>
    %21 = arith.mulf %2, %20 : vector<8x32xf32>
    %cst_14 = arith.constant dense<0.000000e+00> : vector<8x8xf32>
    %22 = tpu.matmul %13, %13, %cst_14 {dimension_numbers = #tpu.dot_dimension_numbers<[1], [1], [0], [0], [0, 0, 1, 0], [], []>} : vector<8x32xf32>, vector<8x32xf32>, vector<8x8xf32> -> vector<8x8xf32>
    %cst_15 = arith.constant 1.42857146 : f32
    %23 = vector.broadcast %cst_15 : f32 to vector<8x8xf32>
    %24 = arith.mulf %22, %23 : vector<8x8xf32>
    %cst_16 = arith.constant dense<0.000000e+00> : vector<8x8xf32>
    %25 = tpu.matmul %13, %21, %cst_16 {dimension_numbers = #tpu.dot_dimension_numbers<[1], [1], [0], [0], [0, 0, 1, 0], [], []>} : vector<8x32xf32>, vector<8x32xf32>, vector<8x8xf32> -> vector<8x8xf32>
    %cst_17 = arith.constant 1.42857146 : f32
    %26 = vector.broadcast %cst_17 : f32 to vector<8x8xf32>
    %27 = arith.mulf %25, %26 : vector<8x8xf32>
    %cst_18 = arith.constant dense<0.000000e+00> : vector<8x8xf32>
    %28 = tpu.matmul %21, %13, %cst_18 {dimension_numbers = #tpu.dot_dimension_numbers<[1], [1], [0], [0], [0, 0, 1, 0], [], []>} : vector<8x32xf32>, vector<8x32xf32>, vector<8x8xf32> -> vector<8x8xf32>
    %cst_19 = arith.constant 1.42857146 : f32
    %29 = vector.broadcast %cst_19 : f32 to vector<8x8xf32>
    %30 = arith.mulf %28, %29 : vector<8x8xf32>
    %cst_20 = arith.constant dense<0.000000e+00> : vector<8x8xf32>
    %31 = tpu.matmul %21, %21, %cst_20 {dimension_numbers = #tpu.dot_dimension_numbers<[1], [1], [0], [0], [0, 0, 1, 0], [], []>} : vector<8x32xf32>, vector<8x32xf32>, vector<8x8xf32> -> vector<8x8xf32>
    %cst_21 = arith.constant 1.42857146 : f32
    %32 = vector.broadcast %cst_21 : f32 to vector<8x8xf32>
    %33 = arith.mulf %31, %32 : vector<8x8xf32>
    %34 = arith.mulf %13, %13 : vector<8x32xf32>
    %cst_22 = arith.constant dense<0.000000e+00> : vector<8xf32>
    %35 = vector.multi_reduction <add>, %34, %cst_22 [1] : vector<8x32xf32> to vector<8xf32>
    %36 = vector.shape_cast %35 : vector<8xf32> to vector<8x1xf32>
    %cst_23 = arith.constant 1.42857146 : f32
    %37 = vector.broadcast %cst_23 : f32 to vector<8x1xf32>
    %38 = arith.mulf %36, %37 : vector<8x1xf32>
    %39 = arith.mulf %21, %21 : vector<8x32xf32>
    %cst_24 = arith.constant dense<0.000000e+00> : vector<8xf32>
    %40 = vector.multi_reduction <add>, %39, %cst_24 [1] : vector<8x32xf32> to vector<8xf32>
    %41 = vector.shape_cast %40 : vector<8xf32> to vector<8x1xf32>
    %cst_25 = arith.constant 1.42857146 : f32
    %42 = vector.broadcast %cst_25 : f32 to vector<8x1xf32>
    %43 = arith.mulf %41, %42 : vector<8x1xf32>
    %44 = arith.mulf %13, %21 : vector<8x32xf32>
    %cst_26 = arith.constant dense<0.000000e+00> : vector<8xf32>
    %45 = vector.multi_reduction <add>, %44, %cst_26 [1] : vector<8x32xf32> to vector<8xf32>
    %46 = vector.shape_cast %45 : vector<8xf32> to vector<8x1xf32>
    %cst_27 = arith.constant 1.42857146 : f32
    %47 = vector.broadcast %cst_27 : f32 to vector<8x1xf32>
    %48 = arith.mulf %46, %47 : vector<8x1xf32>
    %cst_28 = arith.constant dense<0.000000e+00> : vector<8xf32>
    %49 = vector.multi_reduction <add>, %24, %cst_28 [1] : vector<8x8xf32> to vector<8xf32>
    %50 = vector.shape_cast %49 : vector<8xf32> to vector<8x1xf32>
    %cst_29 = arith.constant dense<0.000000e+00> : vector<8xf32>
    %51 = vector.multi_reduction <add>, %27, %cst_29 [1] : vector<8x8xf32> to vector<8xf32>
    %52 = vector.shape_cast %51 : vector<8xf32> to vector<8x1xf32>
    %53 = arith.addf %50, %52 : vector<8x1xf32>
    %cst_30 = arith.constant dense<0.000000e+00> : vector<8xf32>
    %54 = vector.multi_reduction <add>, %30, %cst_30 [1] : vector<8x8xf32> to vector<8xf32>
    %55 = vector.shape_cast %54 : vector<8xf32> to vector<8x1xf32>
    %cst_31 = arith.constant dense<0.000000e+00> : vector<8xf32>
    %56 = vector.multi_reduction <add>, %33, %cst_31 [1] : vector<8x8xf32> to vector<8xf32>
    %57 = vector.shape_cast %56 : vector<8xf32> to vector<8x1xf32>
    %58 = arith.addf %55, %57 : vector<8x1xf32>
    %59 = math.exp %24 : vector<8x8xf32>
    %cst_32 = arith.constant dense<0.000000e+00> : vector<8xf32>
    %60 = vector.multi_reduction <add>, %59, %cst_32 [1] : vector<8x8xf32> to vector<8xf32>
    %61 = vector.shape_cast %60 : vector<8xf32> to vector<8x1xf32>
    %62 = math.exp %27 : vector<8x8xf32>
    %cst_33 = arith.constant dense<0.000000e+00> : vector<8xf32>
    %63 = vector.multi_reduction <add>, %62, %cst_33 [1] : vector<8x8xf32> to vector<8xf32>
    %64 = vector.shape_cast %63 : vector<8xf32> to vector<8x1xf32>
    %65 = arith.addf %61, %64 : vector<8x1xf32>
    %66 = math.exp %30 : vector<8x8xf32>
    %cst_34 = arith.constant dense<0.000000e+00> : vector<8xf32>
    %67 = vector.multi_reduction <add>, %66, %cst_34 [1] : vector<8x8xf32> to vector<8xf32>
    %68 = vector.shape_cast %67 : vector<8xf32> to vector<8x1xf32>
    %69 = math.exp %33 : vector<8x8xf32>
    %cst_35 = arith.constant dense<0.000000e+00> : vector<8xf32>
    %70 = vector.multi_reduction <add>, %69, %cst_35 [1] : vector<8x8xf32> to vector<8xf32>
    %71 = vector.shape_cast %70 : vector<8xf32> to vector<8x1xf32>
    %72 = arith.addf %68, %71 : vector<8x1xf32>
    %73 = arith.subf %53, %38 : vector<8x1xf32>
    %74 = arith.subf %73, %48 : vector<8x1xf32>
    %75 = arith.subf %58, %43 : vector<8x1xf32>
    %76 = arith.subf %75, %48 : vector<8x1xf32>
    %77 = math.exp %38 : vector<8x1xf32>
    %78 = arith.subf %65, %77 : vector<8x1xf32>
    %79 = math.log %78 : vector<8x1xf32>
    %80 = math.exp %43 : vector<8x1xf32>
    %81 = arith.subf %72, %80 : vector<8x1xf32>
    %82 = math.log %81 : vector<8x1xf32>
    %cst_36 = arith.constant 8.000000e-01 : f32
    %83 = vector.broadcast %cst_36 : f32 to vector<8x1xf32>
    %84 = arith.mulf %83, %48 : vector<8x1xf32>
    %85 = arith.subf %79, %84 : vector<8x1xf32>
    %86 = arith.addf %48, %74 : vector<8x1xf32>
    %cst_37 = arith.constant 0.0133333337 : f32
    %87 = vector.broadcast %cst_37 : f32 to vector<8x1xf32>
    %88 = arith.mulf %87, %86 : vector<8x1xf32>
    %89 = arith.subf %85, %88 : vector<8x1xf32>
    %cst_38 = arith.constant 8.000000e-01 : f32
    %90 = vector.broadcast %cst_38 : f32 to vector<8x1xf32>
    %91 = arith.mulf %90, %48 : vector<8x1xf32>
    %92 = arith.subf %82, %91 : vector<8x1xf32>
    %93 = arith.addf %48, %76 : vector<8x1xf32>
    %cst_39 = arith.constant 0.0133333337 : f32
    %94 = vector.broadcast %cst_39 : f32 to vector<8x1xf32>
    %95 = arith.mulf %94, %93 : vector<8x1xf32>
    %96 = arith.subf %92, %95 : vector<8x1xf32>
    %97 = vector.shape_cast %89 : vector<8x1xf32> to vector<1x8x1xf32>
    %cst_40 = arith.constant dense<0.000000e+00> : vector<1xf32>
    %98 = vector.multi_reduction <add>, %97, %cst_40 [1, 2] : vector<1x8x1xf32> to vector<1xf32>
    %99 = vector.shape_cast %98 : vector<1xf32> to vector<1x1x1xf32>
    %100 = vector.extract %99[0, 0, 0] : f32 from vector<1x1x1xf32>
    %101 = vector.shape_cast %96 : vector<8x1xf32> to vector<1x8x1xf32>
    %cst_41 = arith.constant dense<0.000000e+00> : vector<1xf32>
    %102 = vector.multi_reduction <add>, %101, %cst_41 [1, 2] : vector<1x8x1xf32> to vector<1xf32>
    %103 = vector.shape_cast %102 : vector<1xf32> to vector<1x1x1xf32>
    %104 = vector.extract %103[0, 0, 0] : f32 from vector<1x1x1xf32>
    %105 = arith.addf %100, %104 : f32
    %cst_42 = arith.constant 1.600000e+01 : f32
    %106 = arith.divf %105, %cst_42 : f32
    %cst_43 = arith.constant dense<0.000000e+00> : vector<6x6xf32>
    %107 = tpu.matmul %3, %3, %cst_43 {dimension_numbers = #tpu.dot_dimension_numbers<[1], [1], [0], [0], [0, 0, 1, 0], [], []>} : vector<6x32xf32>, vector<6x32xf32>, vector<6x6xf32> -> vector<6x6xf32>
    %cst_44 = arith.constant 1.250000e+00 : f32
    %108 = vector.broadcast %cst_44 : f32 to vector<6x6xf32>
    %109 = arith.mulf %107, %108 : vector<6x6xf32>
    %110 = math.exp %109 : vector<6x6xf32>
    %cst_45 = arith.constant dense<0.000000e+00> : vector<6x6xf32>
    %111 = tpu.matmul %3, %5, %cst_45 {dimension_numbers = #tpu.dot_dimension_numbers<[1], [1], [0], [0], [0, 0, 1, 0], [], []>} : vector<6x32xf32>, vector<6x32xf32>, vector<6x6xf32> -> vector<6x6xf32>
    %cst_46 = arith.constant 1.250000e+00 : f32
    %112 = vector.broadcast %cst_46 : f32 to vector<6x6xf32>
    %113 = arith.mulf %111, %112 : vector<6x6xf32>
    %114 = math.exp %113 : vector<6x6xf32>
    %cst_47 = arith.constant dense<0.000000e+00> : vector<6x6xf32>
    %115 = tpu.matmul %5, %3, %cst_47 {dimension_numbers = #tpu.dot_dimension_numbers<[1], [1], [0], [0], [0, 0, 1, 0], [], []>} : vector<6x32xf32>, vector<6x32xf32>, vector<6x6xf32> -> vector<6x6xf32>
    %cst_48 = arith.constant 1.250000e+00 : f32
    %116 = vector.broadcast %cst_48 : f32 to vector<6x6xf32>
    %117 = arith.mulf %115, %116 : vector<6x6xf32>
    %118 = math.exp %117 : vector<6x6xf32>
    %cst_49 = arith.constant dense<0.000000e+00> : vector<6x6xf32>
    %119 = tpu.matmul %5, %5, %cst_49 {dimension_numbers = #tpu.dot_dimension_numbers<[1], [1], [0], [0], [0, 0, 1, 0], [], []>} : vector<6x32xf32>, vector<6x32xf32>, vector<6x6xf32> -> vector<6x6xf32>
    %cst_50 = arith.constant 1.250000e+00 : f32
    %120 = vector.broadcast %cst_50 : f32 to vector<6x6xf32>
    %121 = arith.mulf %119, %120 : vector<6x6xf32>
    %122 = math.exp %121 : vector<6x6xf32>
    %123 = arith.mulf %3, %3 : vector<6x32xf32>
    %cst_51 = arith.constant dense<0.000000e+00> : vector<6xf32>
    %124 = vector.multi_reduction <add>, %123, %cst_51 [1] : vector<6x32xf32> to vector<6xf32>
    %125 = vector.shape_cast %124 : vector<6xf32> to vector<6x1xf32>
    %cst_52 = arith.constant 1.250000e+00 : f32
    %126 = vector.broadcast %cst_52 : f32 to vector<6x1xf32>
    %127 = arith.mulf %125, %126 : vector<6x1xf32>
    %128 = math.exp %127 : vector<6x1xf32>
    %129 = arith.mulf %5, %5 : vector<6x32xf32>
    %cst_53 = arith.constant dense<0.000000e+00> : vector<6xf32>
    %130 = vector.multi_reduction <add>, %129, %cst_53 [1] : vector<6x32xf32> to vector<6xf32>
    %131 = vector.shape_cast %130 : vector<6xf32> to vector<6x1xf32>
    %cst_54 = arith.constant 1.250000e+00 : f32
    %132 = vector.broadcast %cst_54 : f32 to vector<6x1xf32>
    %133 = arith.mulf %131, %132 : vector<6x1xf32>
    %134 = math.exp %133 : vector<6x1xf32>
    %135 = arith.mulf %3, %5 : vector<6x32xf32>
    %cst_55 = arith.constant dense<0.000000e+00> : vector<6xf32>
    %136 = vector.multi_reduction <add>, %135, %cst_55 [1] : vector<6x32xf32> to vector<6xf32>
    %137 = vector.shape_cast %136 : vector<6xf32> to vector<6x1xf32>
    %cst_56 = arith.constant 1.250000e+00 : f32
    %138 = vector.broadcast %cst_56 : f32 to vector<6x1xf32>
    %139 = arith.mulf %137, %138 : vector<6x1xf32>
    %140 = math.exp %139 : vector<6x1xf32>
    %cst_57 = arith.constant dense<0.000000e+00> : vector<6xf32>
    %141 = vector.multi_reduction <add>, %110, %cst_57 [1] : vector<6x6xf32> to vector<6xf32>
    %142 = vector.shape_cast %141 : vector<6xf32> to vector<6x1xf32>
    %cst_58 = arith.constant dense<0.000000e+00> : vector<6xf32>
    %143 = vector.multi_reduction <add>, %114, %cst_58 [1] : vector<6x6xf32> to vector<6xf32>
    %144 = vector.shape_cast %143 : vector<6xf32> to vector<6x1xf32>
    %145 = arith.addf %142, %144 : vector<6x1xf32>
    %146 = arith.subf %145, %128 : vector<6x1xf32>
    %147 = arith.subf %146, %140 : vector<6x1xf32>
    %cst_59 = arith.constant dense<0.000000e+00> : vector<6xf32>
    %148 = vector.multi_reduction <add>, %118, %cst_59 [1] : vector<6x6xf32> to vector<6xf32>
    %149 = vector.shape_cast %148 : vector<6xf32> to vector<6x1xf32>
    %cst_60 = arith.constant dense<0.000000e+00> : vector<6xf32>
    %150 = vector.multi_reduction <add>, %122, %cst_60 [1] : vector<6x6xf32> to vector<6xf32>
    %151 = vector.shape_cast %150 : vector<6xf32> to vector<6x1xf32>
    %152 = arith.addf %149, %151 : vector<6x1xf32>
    %153 = arith.subf %152, %134 : vector<6x1xf32>
    %154 = arith.subf %153, %140 : vector<6x1xf32>
    %155 = arith.mulf %110, %110 : vector<6x6xf32>
    %cst_61 = arith.constant dense<0.000000e+00> : vector<6xf32>
    %156 = vector.multi_reduction <add>, %155, %cst_61 [1] : vector<6x6xf32> to vector<6xf32>
    %157 = vector.shape_cast %156 : vector<6xf32> to vector<6x1xf32>
    %158 = arith.mulf %114, %114 : vector<6x6xf32>
    %cst_62 = arith.constant dense<0.000000e+00> : vector<6xf32>
    %159 = vector.multi_reduction <add>, %158, %cst_62 [1] : vector<6x6xf32> to vector<6xf32>
    %160 = vector.shape_cast %159 : vector<6xf32> to vector<6x1xf32>
    %161 = arith.addf %157, %160 : vector<6x1xf32>
    %162 = arith.mulf %128, %128 : vector<6x1xf32>
    %163 = arith.subf %161, %162 : vector<6x1xf32>
    %164 = arith.mulf %140, %140 : vector<6x1xf32>
    %165 = arith.subf %163, %164 : vector<6x1xf32>
    %166 = arith.mulf %118, %118 : vector<6x6xf32>
    %cst_63 = arith.constant dense<0.000000e+00> : vector<6xf32>
    %167 = vector.multi_reduction <add>, %166, %cst_63 [1] : vector<6x6xf32> to vector<6xf32>
    %168 = vector.shape_cast %167 : vector<6xf32> to vector<6x1xf32>
    %169 = arith.mulf %122, %122 : vector<6x6xf32>
    %cst_64 = arith.constant dense<0.000000e+00> : vector<6xf32>
    %170 = vector.multi_reduction <add>, %169, %cst_64 [1] : vector<6x6xf32> to vector<6xf32>
    %171 = vector.shape_cast %170 : vector<6xf32> to vector<6x1xf32>
    %172 = arith.addf %168, %171 : vector<6x1xf32>
    %173 = arith.mulf %134, %134 : vector<6x1xf32>
    %174 = arith.subf %172, %173 : vector<6x1xf32>
    %175 = arith.mulf %140, %140 : vector<6x1xf32>
    %176 = arith.subf %174, %175 : vector<6x1xf32>
    %cst_65 = arith.constant 1.000000e+01 : f32
    %177 = vector.broadcast %cst_65 : f32 to vector<6x1xf32>
    %178 = arith.mulf %165, %177 : vector<6x1xf32>
    %179 = arith.divf %178, %147 : vector<6x1xf32>
    %cst_66 = arith.constant 1.000000e+01 : f32
    %180 = vector.broadcast %cst_66 : f32 to vector<6x1xf32>
    %181 = arith.mulf %176, %180 : vector<6x1xf32>
    %182 = arith.divf %181, %154 : vector<6x1xf32>
    %cst_67 = arith.constant -1.000000e+00 : f32
    %183 = vector.broadcast %cst_67 : f32 to vector<6x1xf32>
    %184 = arith.mulf %183, %140 : vector<6x1xf32>
    %185 = arith.addf %184, %179 : vector<6x1xf32>
    %cst_68 = arith.constant 0.899999976 : f32
    %186 = vector.broadcast %cst_68 : f32 to vector<6x1xf32>
    %187 = arith.divf %185, %186 : vector<6x1xf32>
    %cst_69 = arith.constant -1.000000e+00 : f32
    %188 = vector.broadcast %cst_69 : f32 to vector<6x1xf32>
    %189 = arith.mulf %188, %140 : vector<6x1xf32>
    %190 = arith.addf %189, %182 : vector<6x1xf32>
    %cst_70 = arith.constant 0.899999976 : f32
    %191 = vector.broadcast %cst_70 : f32 to vector<6x1xf32>
    %192 = arith.divf %190, %191 : vector<6x1xf32>
    %cst_71 = arith.constant 2.86504793 : f32
    %193 = vector.broadcast %cst_71 : f32 to vector<6x1xf32>
    %194 = arith.maximumf %187, %193 : vector<6x1xf32>
    %cst_72 = arith.constant 2.86504793 : f32
    %195 = vector.broadcast %cst_72 : f32 to vector<6x1xf32>
    %196 = arith.maximumf %192, %195 : vector<6x1xf32>
    %197 = arith.addf %140, %194 : vector<6x1xf32>
    %198 = arith.divf %140, %197 : vector<6x1xf32>
    %199 = math.log %198 : vector<6x1xf32>
    %cst_73 = arith.constant 0.000000e+00 : f32
    %200 = vector.broadcast %cst_73 : f32 to vector<6x1xf32>
    %201 = arith.subf %200, %199 : vector<6x1xf32>
    %202 = arith.addf %140, %196 : vector<6x1xf32>
    %203 = arith.divf %140, %202 : vector<6x1xf32>
    %204 = math.log %203 : vector<6x1xf32>
    %cst_74 = arith.constant 0.000000e+00 : f32
    %205 = vector.broadcast %cst_74 : f32 to vector<6x1xf32>
    %206 = arith.subf %205, %204 : vector<6x1xf32>
    %207 = vector.shape_cast %201 : vector<6x1xf32> to vector<1x6x1xf32>
    %cst_75 = arith.constant dense<0.000000e+00> : vector<1xf32>
    %208 = vector.multi_reduction <add>, %207, %cst_75 [1, 2] : vector<1x6x1xf32> to vector<1xf32>
    %209 = vector.shape_cast %208 : vector<1xf32> to vector<1x1x1xf32>
    %210 = vector.extract %209[0, 0, 0] : f32 from vector<1x1x1xf32>
    %211 = vector.shape_cast %206 : vector<6x1xf32> to vector<1x6x1xf32>
    %cst_76 = arith.constant dense<0.000000e+00> : vector<1xf32>
    %212 = vector.multi_reduction <add>, %211, %cst_76 [1, 2] : vector<1x6x1xf32> to vector<1xf32>
    %213 = vector.shape_cast %212 : vector<1xf32> to vector<1x1x1xf32>
    %214 = vector.extract %213[0, 0, 0] : f32 from vector<1x1x1xf32>
    %215 = arith.addf %210, %214 : f32
    %cst_77 = arith.constant 1.200000e+01 : f32
    %216 = arith.divf %215, %cst_77 : f32
    %217 = arith.mulf %4, %4 : vector<6x32xf32>
    %cst_78 = arith.constant dense<0.000000e+00> : vector<6xf32>
    %218 = vector.multi_reduction <add>, %217, %cst_78 [1] : vector<6x32xf32> to vector<6xf32>
    %219 = vector.shape_cast %218 : vector<6xf32> to vector<6x1xf32>
    %cst_79 = arith.constant 1.000000e-16 : f32
    %220 = vector.broadcast %cst_79 : f32 to vector<6x1xf32>
    %221 = arith.maximumf %219, %220 : vector<6x1xf32>
    %222 = math.rsqrt %221 : vector<6x1xf32>
    %223 = vector.broadcast %222 : vector<6x1xf32> to vector<6x32xf32>
    %224 = arith.mulf %4, %223 : vector<6x32xf32>
    %225 = arith.mulf %5, %5 : vector<6x32xf32>
    %cst_80 = arith.constant dense<0.000000e+00> : vector<6xf32>
    %226 = vector.multi_reduction <add>, %225, %cst_80 [1] : vector<6x32xf32> to vector<6xf32>
    %227 = vector.shape_cast %226 : vector<6xf32> to vector<6x1xf32>
    %cst_81 = arith.constant 1.000000e-16 : f32
    %228 = vector.broadcast %cst_81 : f32 to vector<6x1xf32>
    %229 = arith.maximumf %227, %228 : vector<6x1xf32>
    %230 = math.rsqrt %229 : vector<6x1xf32>
    %231 = vector.broadcast %230 : vector<6x1xf32> to vector<6x32xf32>
    %232 = arith.mulf %5, %231 : vector<6x32xf32>
    %cst_82 = arith.constant dense<0.000000e+00> : vector<6x6xf32>
    %233 = tpu.matmul %224, %224, %cst_82 {dimension_numbers = #tpu.dot_dimension_numbers<[1], [1], [0], [0], [0, 0, 1, 0], [], []>} : vector<6x32xf32>, vector<6x32xf32>, vector<6x6xf32> -> vector<6x6xf32>
    %cst_83 = arith.constant 1.42857146 : f32
    %234 = vector.broadcast %cst_83 : f32 to vector<6x6xf32>
    %235 = arith.mulf %233, %234 : vector<6x6xf32>
    %cst_84 = arith.constant dense<0.000000e+00> : vector<6x6xf32>
    %236 = tpu.matmul %224, %232, %cst_84 {dimension_numbers = #tpu.dot_dimension_numbers<[1], [1], [0], [0], [0, 0, 1, 0], [], []>} : vector<6x32xf32>, vector<6x32xf32>, vector<6x6xf32> -> vector<6x6xf32>
    %cst_85 = arith.constant 1.42857146 : f32
    %237 = vector.broadcast %cst_85 : f32 to vector<6x6xf32>
    %238 = arith.mulf %236, %237 : vector<6x6xf32>
    %cst_86 = arith.constant dense<0.000000e+00> : vector<6x6xf32>
    %239 = tpu.matmul %232, %224, %cst_86 {dimension_numbers = #tpu.dot_dimension_numbers<[1], [1], [0], [0], [0, 0, 1, 0], [], []>} : vector<6x32xf32>, vector<6x32xf32>, vector<6x6xf32> -> vector<6x6xf32>
    %cst_87 = arith.constant 1.42857146 : f32
    %240 = vector.broadcast %cst_87 : f32 to vector<6x6xf32>
    %241 = arith.mulf %239, %240 : vector<6x6xf32>
    %cst_88 = arith.constant dense<0.000000e+00> : vector<6x6xf32>
    %242 = tpu.matmul %232, %232, %cst_88 {dimension_numbers = #tpu.dot_dimension_numbers<[1], [1], [0], [0], [0, 0, 1, 0], [], []>} : vector<6x32xf32>, vector<6x32xf32>, vector<6x6xf32> -> vector<6x6xf32>
    %cst_89 = arith.constant 1.42857146 : f32
    %243 = vector.broadcast %cst_89 : f32 to vector<6x6xf32>
    %244 = arith.mulf %242, %243 : vector<6x6xf32>
    %245 = arith.mulf %224, %224 : vector<6x32xf32>
    %cst_90 = arith.constant dense<0.000000e+00> : vector<6xf32>
    %246 = vector.multi_reduction <add>, %245, %cst_90 [1] : vector<6x32xf32> to vector<6xf32>
    %247 = vector.shape_cast %246 : vector<6xf32> to vector<6x1xf32>
    %cst_91 = arith.constant 1.42857146 : f32
    %248 = vector.broadcast %cst_91 : f32 to vector<6x1xf32>
    %249 = arith.mulf %247, %248 : vector<6x1xf32>
    %250 = arith.mulf %232, %232 : vector<6x32xf32>
    %cst_92 = arith.constant dense<0.000000e+00> : vector<6xf32>
    %251 = vector.multi_reduction <add>, %250, %cst_92 [1] : vector<6x32xf32> to vector<6xf32>
    %252 = vector.shape_cast %251 : vector<6xf32> to vector<6x1xf32>
    %cst_93 = arith.constant 1.42857146 : f32
    %253 = vector.broadcast %cst_93 : f32 to vector<6x1xf32>
    %254 = arith.mulf %252, %253 : vector<6x1xf32>
    %255 = arith.mulf %224, %232 : vector<6x32xf32>
    %cst_94 = arith.constant dense<0.000000e+00> : vector<6xf32>
    %256 = vector.multi_reduction <add>, %255, %cst_94 [1] : vector<6x32xf32> to vector<6xf32>
    %257 = vector.shape_cast %256 : vector<6xf32> to vector<6x1xf32>
    %cst_95 = arith.constant 1.42857146 : f32
    %258 = vector.broadcast %cst_95 : f32 to vector<6x1xf32>
    %259 = arith.mulf %257, %258 : vector<6x1xf32>
    %cst_96 = arith.constant dense<0.000000e+00> : vector<6xf32>
    %260 = vector.multi_reduction <add>, %235, %cst_96 [1] : vector<6x6xf32> to vector<6xf32>
    %261 = vector.shape_cast %260 : vector<6xf32> to vector<6x1xf32>
    %cst_97 = arith.constant dense<0.000000e+00> : vector<6xf32>
    %262 = vector.multi_reduction <add>, %238, %cst_97 [1] : vector<6x6xf32> to vector<6xf32>
    %263 = vector.shape_cast %262 : vector<6xf32> to vector<6x1xf32>
    %264 = arith.addf %261, %263 : vector<6x1xf32>
    %cst_98 = arith.constant dense<0.000000e+00> : vector<6xf32>
    %265 = vector.multi_reduction <add>, %241, %cst_98 [1] : vector<6x6xf32> to vector<6xf32>
    %266 = vector.shape_cast %265 : vector<6xf32> to vector<6x1xf32>
    %cst_99 = arith.constant dense<0.000000e+00> : vector<6xf32>
    %267 = vector.multi_reduction <add>, %244, %cst_99 [1] : vector<6x6xf32> to vector<6xf32>
    %268 = vector.shape_cast %267 : vector<6xf32> to vector<6x1xf32>
    %269 = arith.addf %266, %268 : vector<6x1xf32>
    %270 = math.exp %235 : vector<6x6xf32>
    %cst_100 = arith.constant dense<0.000000e+00> : vector<6xf32>
    %271 = vector.multi_reduction <add>, %270, %cst_100 [1] : vector<6x6xf32> to vector<6xf32>
    %272 = vector.shape_cast %271 : vector<6xf32> to vector<6x1xf32>
    %273 = math.exp %238 : vector<6x6xf32>
    %cst_101 = arith.constant dense<0.000000e+00> : vector<6xf32>
    %274 = vector.multi_reduction <add>, %273, %cst_101 [1] : vector<6x6xf32> to vector<6xf32>
    %275 = vector.shape_cast %274 : vector<6xf32> to vector<6x1xf32>
    %276 = arith.addf %272, %275 : vector<6x1xf32>
    %277 = math.exp %241 : vector<6x6xf32>
    %cst_102 = arith.constant dense<0.000000e+00> : vector<6xf32>
    %278 = vector.multi_reduction <add>, %277, %cst_102 [1] : vector<6x6xf32> to vector<6xf32>
    %279 = vector.shape_cast %278 : vector<6xf32> to vector<6x1xf32>
    %280 = math.exp %244 : vector<6x6xf32>
    %cst_103 = arith.constant dense<0.000000e+00> : vector<6xf32>
    %281 = vector.multi_reduction <add>, %280, %cst_103 [1] : vector<6x6xf32> to vector<6xf32>
    %282 = vector.shape_cast %281 : vector<6xf32> to vector<6x1xf32>
    %283 = arith.addf %279, %282 : vector<6x1xf32>
    %284 = arith.subf %264, %249 : vector<6x1xf32>
    %285 = arith.subf %284, %259 : vector<6x1xf32>
    %286 = arith.subf %269, %254 : vector<6x1xf32>
    %287 = arith.subf %286, %259 : vector<6x1xf32>
    %288 = math.exp %249 : vector<6x1xf32>
    %289 = arith.subf %276, %288 : vector<6x1xf32>
    %290 = math.log %289 : vector<6x1xf32>
    %291 = math.exp %254 : vector<6x1xf32>
    %292 = arith.subf %283, %291 : vector<6x1xf32>
    %293 = math.log %292 : vector<6x1xf32>
    %cst_104 = arith.constant 8.000000e-01 : f32
    %294 = vector.broadcast %cst_104 : f32 to vector<6x1xf32>
    %295 = arith.mulf %294, %259 : vector<6x1xf32>
    %296 = arith.subf %290, %295 : vector<6x1xf32>
    %297 = arith.addf %259, %285 : vector<6x1xf32>
    %cst_105 = arith.constant 0.0181818176 : f32
    %298 = vector.broadcast %cst_105 : f32 to vector<6x1xf32>
    %299 = arith.mulf %298, %297 : vector<6x1xf32>
    %300 = arith.subf %296, %299 : vector<6x1xf32>
    %cst_106 = arith.constant 8.000000e-01 : f32
    %301 = vector.broadcast %cst_106 : f32 to vector<6x1xf32>
    %302 = arith.mulf %301, %259 : vector<6x1xf32>
    %303 = arith.subf %293, %302 : vector<6x1xf32>
    %304 = arith.addf %259, %287 : vector<6x1xf32>
    %cst_107 = arith.constant 0.0181818176 : f32
    %305 = vector.broadcast %cst_107 : f32 to vector<6x1xf32>
    %306 = arith.mulf %305, %304 : vector<6x1xf32>
    %307 = arith.subf %303, %306 : vector<6x1xf32>
    %308 = vector.shape_cast %300 : vector<6x1xf32> to vector<1x6x1xf32>
    %cst_108 = arith.constant dense<0.000000e+00> : vector<1xf32>
    %309 = vector.multi_reduction <add>, %308, %cst_108 [1, 2] : vector<1x6x1xf32> to vector<1xf32>
    %310 = vector.shape_cast %309 : vector<1xf32> to vector<1x1x1xf32>
    %311 = vector.extract %310[0, 0, 0] : f32 from vector<1x1x1xf32>
    %312 = vector.shape_cast %307 : vector<6x1xf32> to vector<1x6x1xf32>
    %cst_109 = arith.constant dense<0.000000e+00> : vector<1xf32>
    %313 = vector.multi_reduction <add>, %312, %cst_109 [1, 2] : vector<1x6x1xf32> to vector<1xf32>
    %314 = vector.shape_cast %313 : vector<1xf32> to vector<1x1x1xf32>
    %315 = vector.extract %314[0, 0, 0] : f32 from vector<1x1x1xf32>
    %316 = arith.addf %311, %315 : f32
    %cst_110 = arith.constant 1.200000e+01 : f32
    %317 = arith.divf %316, %cst_110 : f32
    %cst_111 = arith.constant dense<0.000000e+00> : vector<8x8xf32>
    %318 = tpu.matmul %0, %0, %cst_111 {dimension_numbers = #tpu.dot_dimension_numbers<[1], [1], [0], [0], [0, 0, 1, 0], [], []>} : vector<8x32xf32>, vector<8x32xf32>, vector<8x8xf32> -> vector<8x8xf32>
    %cst_112 = arith.constant 1.250000e+00 : f32
    %319 = vector.broadcast %cst_112 : f32 to vector<8x8xf32>
    %320 = arith.mulf %318, %319 : vector<8x8xf32>
    %321 = math.exp %320 : vector<8x8xf32>
    %cst_113 = arith.constant dense<0.000000e+00> : vector<8x8xf32>
    %322 = tpu.matmul %0, %1, %cst_113 {dimension_numbers = #tpu.dot_dimension_numbers<[1], [1], [0], [0], [0, 0, 1, 0], [], []>} : vector<8x32xf32>, vector<8x32xf32>, vector<8x8xf32> -> vector<8x8xf32>
    %cst_114 = arith.constant 1.250000e+00 : f32
    %323 = vector.broadcast %cst_114 : f32 to vector<8x8xf32>
    %324 = arith.mulf %322, %323 : vector<8x8xf32>
    %325 = math.exp %324 : vector<8x8xf32>
    %cst_115 = arith.constant dense<0.000000e+00> : vector<8x8xf32>
    %326 = tpu.matmul %1, %0, %cst_115 {dimension_numbers = #tpu.dot_dimension_numbers<[1], [1], [0], [0], [0, 0, 1, 0], [], []>} : vector<8x32xf32>, vector<8x32xf32>, vector<8x8xf32> -> vector<8x8xf32>
    %cst_116 = arith.constant 1.250000e+00 : f32
    %327 = vector.broadcast %cst_116 : f32 to vector<8x8xf32>
    %328 = arith.mulf %326, %327 : vector<8x8xf32>
    %329 = math.exp %328 : vector<8x8xf32>
    %cst_117 = arith.constant dense<0.000000e+00> : vector<8x8xf32>
    %330 = tpu.matmul %1, %1, %cst_117 {dimension_numbers = #tpu.dot_dimension_numbers<[1], [1], [0], [0], [0, 0, 1, 0], [], []>} : vector<8x32xf32>, vector<8x32xf32>, vector<8x8xf32> -> vector<8x8xf32>
    %cst_118 = arith.constant 1.250000e+00 : f32
    %331 = vector.broadcast %cst_118 : f32 to vector<8x8xf32>
    %332 = arith.mulf %330, %331 : vector<8x8xf32>
    %333 = math.exp %332 : vector<8x8xf32>
    %334 = arith.mulf %0, %0 : vector<8x32xf32>
    %cst_119 = arith.constant dense<0.000000e+00> : vector<8xf32>
    %335 = vector.multi_reduction <add>, %334, %cst_119 [1] : vector<8x32xf32> to vector<8xf32>
    %336 = vector.shape_cast %335 : vector<8xf32> to vector<8x1xf32>
    %cst_120 = arith.constant 1.250000e+00 : f32
    %337 = vector.broadcast %cst_120 : f32 to vector<8x1xf32>
    %338 = arith.mulf %336, %337 : vector<8x1xf32>
    %339 = math.exp %338 : vector<8x1xf32>
    %340 = arith.mulf %1, %1 : vector<8x32xf32>
    %cst_121 = arith.constant dense<0.000000e+00> : vector<8xf32>
    %341 = vector.multi_reduction <add>, %340, %cst_121 [1] : vector<8x32xf32> to vector<8xf32>
    %342 = vector.shape_cast %341 : vector<8xf32> to vector<8x1xf32>
    %cst_122 = arith.constant 1.250000e+00 : f32
    %343 = vector.broadcast %cst_122 : f32 to vector<8x1xf32>
    %344 = arith.mulf %342, %343 : vector<8x1xf32>
    %345 = math.exp %344 : vector<8x1xf32>
    %346 = arith.mulf %0, %1 : vector<8x32xf32>
    %cst_123 = arith.constant dense<0.000000e+00> : vector<8xf32>
    %347 = vector.multi_reduction <add>, %346, %cst_123 [1] : vector<8x32xf32> to vector<8xf32>
    %348 = vector.shape_cast %347 : vector<8xf32> to vector<8x1xf32>
    %cst_124 = arith.constant 1.250000e+00 : f32
    %349 = vector.broadcast %cst_124 : f32 to vector<8x1xf32>
    %350 = arith.mulf %348, %349 : vector<8x1xf32>
    %351 = math.exp %350 : vector<8x1xf32>
    %cst_125 = arith.constant dense<0.000000e+00> : vector<8xf32>
    %352 = vector.multi_reduction <add>, %321, %cst_125 [1] : vector<8x8xf32> to vector<8xf32>
    %353 = vector.shape_cast %352 : vector<8xf32> to vector<8x1xf32>
    %cst_126 = arith.constant dense<0.000000e+00> : vector<8xf32>
    %354 = vector.multi_reduction <add>, %325, %cst_126 [1] : vector<8x8xf32> to vector<8xf32>
    %355 = vector.shape_cast %354 : vector<8xf32> to vector<8x1xf32>
    %356 = arith.addf %353, %355 : vector<8x1xf32>
    %357 = arith.subf %356, %339 : vector<8x1xf32>
    %358 = arith.subf %357, %351 : vector<8x1xf32>
    %cst_127 = arith.constant dense<0.000000e+00> : vector<8xf32>
    %359 = vector.multi_reduction <add>, %329, %cst_127 [1] : vector<8x8xf32> to vector<8xf32>
    %360 = vector.shape_cast %359 : vector<8xf32> to vector<8x1xf32>
    %cst_128 = arith.constant dense<0.000000e+00> : vector<8xf32>
    %361 = vector.multi_reduction <add>, %333, %cst_128 [1] : vector<8x8xf32> to vector<8xf32>
    %362 = vector.shape_cast %361 : vector<8xf32> to vector<8x1xf32>
    %363 = arith.addf %360, %362 : vector<8x1xf32>
    %364 = arith.subf %363, %345 : vector<8x1xf32>
    %365 = arith.subf %364, %351 : vector<8x1xf32>
    %366 = arith.mulf %321, %321 : vector<8x8xf32>
    %cst_129 = arith.constant dense<0.000000e+00> : vector<8xf32>
    %367 = vector.multi_reduction <add>, %366, %cst_129 [1] : vector<8x8xf32> to vector<8xf32>
    %368 = vector.shape_cast %367 : vector<8xf32> to vector<8x1xf32>
    %369 = arith.mulf %325, %325 : vector<8x8xf32>
    %cst_130 = arith.constant dense<0.000000e+00> : vector<8xf32>
    %370 = vector.multi_reduction <add>, %369, %cst_130 [1] : vector<8x8xf32> to vector<8xf32>
    %371 = vector.shape_cast %370 : vector<8xf32> to vector<8x1xf32>
    %372 = arith.addf %368, %371 : vector<8x1xf32>
    %373 = arith.mulf %339, %339 : vector<8x1xf32>
    %374 = arith.subf %372, %373 : vector<8x1xf32>
    %375 = arith.mulf %351, %351 : vector<8x1xf32>
    %376 = arith.subf %374, %375 : vector<8x1xf32>
    %377 = arith.mulf %329, %329 : vector<8x8xf32>
    %cst_131 = arith.constant dense<0.000000e+00> : vector<8xf32>
    %378 = vector.multi_reduction <add>, %377, %cst_131 [1] : vector<8x8xf32> to vector<8xf32>
    %379 = vector.shape_cast %378 : vector<8xf32> to vector<8x1xf32>
    %380 = arith.mulf %333, %333 : vector<8x8xf32>
    %cst_132 = arith.constant dense<0.000000e+00> : vector<8xf32>
    %381 = vector.multi_reduction <add>, %380, %cst_132 [1] : vector<8x8xf32> to vector<8xf32>
    %382 = vector.shape_cast %381 : vector<8xf32> to vector<8x1xf32>
    %383 = arith.addf %379, %382 : vector<8x1xf32>
    %384 = arith.mulf %345, %345 : vector<8x1xf32>
    %385 = arith.subf %383, %384 : vector<8x1xf32>
    %386 = arith.mulf %351, %351 : vector<8x1xf32>
    %387 = arith.subf %385, %386 : vector<8x1xf32>
    %cst_133 = arith.constant 1.400000e+01 : f32
    %388 = vector.broadcast %cst_133 : f32 to vector<8x1xf32>
    %389 = arith.mulf %376, %388 : vector<8x1xf32>
    %390 = arith.divf %389, %358 : vector<8x1xf32>
    %cst_134 = arith.constant 1.400000e+01 : f32
    %391 = vector.broadcast %cst_134 : f32 to vector<8x1xf32>
    %392 = arith.mulf %387, %391 : vector<8x1xf32>
    %393 = arith.divf %392, %365 : vector<8x1xf32>
    %cst_135 = arith.constant -1.400000e+00 : f32
    %394 = vector.broadcast %cst_135 : f32 to vector<8x1xf32>
    %395 = arith.mulf %394, %351 : vector<8x1xf32>
    %396 = arith.addf %395, %390 : vector<8x1xf32>
    %cst_136 = arith.constant 0.899999976 : f32
    %397 = vector.broadcast %cst_136 : f32 to vector<8x1xf32>
    %398 = arith.divf %396, %397 : vector<8x1xf32>
    %cst_137 = arith.constant -1.400000e+00 : f32
    %399 = vector.broadcast %cst_137 : f32 to vector<8x1xf32>
    %400 = arith.mulf %399, %351 : vector<8x1xf32>
    %401 = arith.addf %400, %393 : vector<8x1xf32>
    %cst_138 = arith.constant 0.899999976 : f32
    %402 = vector.broadcast %cst_138 : f32 to vector<8x1xf32>
    %403 = arith.divf %401, %402 : vector<8x1xf32>
    %cst_139 = arith.constant 4.01106739 : f32
    %404 = vector.broadcast %cst_139 : f32 to vector<8x1xf32>
    %405 = arith.maximumf %398, %404 : vector<8x1xf32>
    %cst_140 = arith.constant 4.01106739 : f32
    %406 = vector.broadcast %cst_140 : f32 to vector<8x1xf32>
    %407 = arith.maximumf %403, %406 : vector<8x1xf32>
    %408 = arith.addf %351, %405 : vector<8x1xf32>
    %409 = arith.divf %351, %408 : vector<8x1xf32>
    %410 = math.log %409 : vector<8x1xf32>
    %cst_141 = arith.constant 0.000000e+00 : f32
    %411 = vector.broadcast %cst_141 : f32 to vector<8x1xf32>
    %412 = arith.subf %411, %410 : vector<8x1xf32>
    %413 = arith.addf %351, %407 : vector<8x1xf32>
    %414 = arith.divf %351, %413 : vector<8x1xf32>
    %415 = math.log %414 : vector<8x1xf32>
    %cst_142 = arith.constant 0.000000e+00 : f32
    %416 = vector.broadcast %cst_142 : f32 to vector<8x1xf32>
    %417 = arith.subf %416, %415 : vector<8x1xf32>
    %418 = vector.shape_cast %412 : vector<8x1xf32> to vector<1x8x1xf32>
    %cst_143 = arith.constant dense<0.000000e+00> : vector<1xf32>
    %419 = vector.multi_reduction <add>, %418, %cst_143 [1, 2] : vector<1x8x1xf32> to vector<1xf32>
    %420 = vector.shape_cast %419 : vector<1xf32> to vector<1x1x1xf32>
    %421 = vector.extract %420[0, 0, 0] : f32 from vector<1x1x1xf32>
    %422 = vector.shape_cast %417 : vector<8x1xf32> to vector<1x8x1xf32>
    %cst_144 = arith.constant dense<0.000000e+00> : vector<1xf32>
    %423 = vector.multi_reduction <add>, %422, %cst_144 [1, 2] : vector<1x8x1xf32> to vector<1xf32>
    %424 = vector.shape_cast %423 : vector<1xf32> to vector<1x1x1xf32>
    %425 = vector.extract %424[0, 0, 0] : f32 from vector<1x1x1xf32>
    %426 = arith.addf %421, %425 : f32
    %cst_145 = arith.constant 1.600000e+01 : f32
    %427 = arith.divf %426, %cst_145 : f32
    %428 = arith.addf %216, %106 : f32
    %429 = arith.addf %428, %317 : f32
    %cst_146 = arith.constant 3.000000e+00 : f32
    %430 = arith.divf %429, %cst_146 : f32
    %431 = arith.addf %430, %427 : f32
    %c0_147 = arith.constant 0 : index
    %432 = memref.load %arg6[%c0_147] : memref<6xf32, #tpu.memory_space<smem>>
    memref.store %106, %arg6[%c0_147] : memref<6xf32, #tpu.memory_space<smem>>
    %c1 = arith.constant 1 : index
    %433 = memref.load %arg6[%c1] : memref<6xf32, #tpu.memory_space<smem>>
    memref.store %216, %arg6[%c1] : memref<6xf32, #tpu.memory_space<smem>>
    %c2 = arith.constant 2 : index
    %434 = memref.load %arg6[%c2] : memref<6xf32, #tpu.memory_space<smem>>
    memref.store %317, %arg6[%c2] : memref<6xf32, #tpu.memory_space<smem>>
    %c3 = arith.constant 3 : index
    %435 = memref.load %arg6[%c3] : memref<6xf32, #tpu.memory_space<smem>>
    memref.store %427, %arg6[%c3] : memref<6xf32, #tpu.memory_space<smem>>
    %c4 = arith.constant 4 : index
    %436 = memref.load %arg6[%c4] : memref<6xf32, #tpu.memory_space<smem>>
    memref.store %430, %arg6[%c4] : memref<6xf32, #tpu.memory_space<smem>>
    %c5 = arith.constant 5 : index
    %437 = memref.load %arg6[%c5] : memref<6xf32, #tpu.memory_space<smem>>
    memref.store %431, %arg6[%c5] : memref<6xf32, #tpu.memory_space<smem>>
    return
  }
}

</mosaic_0001>

<bundles_post_ra>
// kernel: _fused_losses.1
= control target key start
LH: loop header
LB: loop body
LE: loop exit
PB: predicated region body
PF: predicated region fallthrough
CT: control target
= control target key end

     0   :  { %vm31_vm0 = vcmask 261120   ;;  %vm734_vm1 = vcmask 259072   ;;  %s2305_s0 = inlined_call_operand.vmem [shape: f32[8,32], index: 0, kind: input, shape index: {}]   ;;  %s2306_s1 = inlined_call_operand.vmem [shape: f32[8,32], index: 1, kind: input, shape index: {}]   ;;  %s2307_s2 = inlined_call_operand.vmem [shape: f32[8,32], index: 2, kind: input, shape index: {}]   ;;  %s2308_s3 = inlined_call_operand.vmem [shape: f32[6,32], index: 3, kind: input, shape index: {}]   ;;  %s2309_s4 = inlined_call_operand.vmem [shape: f32[6,32], index: 4, kind: input, shape index: {}]   ;;  %s2310_s5 = inlined_call_operand.vmem [shape: f32[6,32], index: 5, kind: input, shape index: {}]   ;;  %s2311_s6 = inlined_call_operand.hbm [shape: f32[6], index: 6, kind: output, shape index: {}]  }
   0x1   :  { %v1994_v0 = vld [vmem:[%s2305_s0] sm:$0xff] }
   0x2   :  { %v26_v1 = vld [vmem:[%s2307_s2] sm:$0xff]  ;;  %v30_v3 = vmul.f32 %v1994_v0, %v1994_v0 }
   0x3   :  { %v2002_v2 = vld [vmem:[%s2310_s5] sm:$0x3f]  ;;  %v38_v4 = vmul.f32 %v26_v1, %v26_v1 }
   0x4   :  { %v741_v5 = vmul.f32 %v2002_v2, %v2002_v2  ;;  %v28_v6 = vld [vmem:[%s2309_s4] sm:$0x3f] }
   0x5   :  { %11 = vsyncpa [#allocation3], 0  ;;  %v850_v7 = vmul.f32 %v28_v6, %v28_v6  ;;  %v32_v8 = vsel %vm31_vm0, %v30_v3, 0.0  ;;  %v39_v10 = vsel %vm31_vm0, %v38_v4, 0.0  ;;  %v2018_v12 = vld [vmem:[%s2308_s3] sm:$0x3f] }
   0x6   :  { %v742_v9 = vsel %vm734_vm1, %v741_v5, 0.0  ;;  %33 = vadd.xlane.f32.xlu0 %v32_v8  ;;  %v733_v13 = vmul.f32 %v2018_v12, %v2018_v12  ;;  %v2026_v15 = vld [vmem:[%s2306_s1] sm:$0xff]  ;;  %v748_v16 = vmul.f32 %v2002_v2, %v2018_v12  ;;  %v1953_v20 = vmov 0.0   ;;  %s1941_s25 = scalar_lea.hbm %s2311_s6, 16 }
   0x7   :  { %743 = vadd.xlane.f32.xlu1 %v742_v9  ;;  %v851_v11 = vsel %vm734_vm1, %v850_v7, 0.0  ;;  %v1549_v17 = vmul.f32 %v2026_v15, %v2026_v15  ;;  %1750 = vmatprep.subr.mxu0 %v1953_v20  ;;  %v1556_v21 = vmul.f32 %v2026_v15, %v1994_v0  ;;  %vm1954_vm2 = vmmov 0   ;;  %p1942_p0 = scmp.ne.s32.totalorder %s2311_s6, %s1941_s25  ;;  %p1945_p1 = scmp.lt.u32.totalorder %s1941_s25, %s2311_s6 }
   0x8   :  { %v735_v14 = vsel %vm734_vm1, %v733_v13, 0.0  ;;  %v749_v18 = vsel %vm734_vm1, %v748_v16, 0.0  ;;  %1755 = vmatprep.subr.mxu1 %v1953_v20  ;;  %1752 = vmatprep.mubr.msk.f32.mxu0 %vm1954_vm2, %v1953_v20  ;;  %vm755_vm3 = vcmask 46080   ;;  %vm350_vm4 = vcmask 64512  }
   0x9   :  { %v1550_v19 = vsel %vm31_vm0, %v1549_v17, 0.0  ;;  %v1557_v22 = vsel %vm31_vm0, %v1556_v21, 0.0  ;;  %1757 = vmatprep.mubr.msk.f32.mxu1 %vm1954_vm2, %v1953_v20  ;;  %vm410_vm5 = vcmask 7168   ;;  %vm825_vm6 = vcmask 5120   ;;  %p1947_p2 = pnand %p1945_p1, %p1942_p0 }
   0xa   :  { %40 = vadd.xlane.f32.xlu0 %v39_v10 }
   0xb   :  { %852 = vadd.xlane.f32.xlu1 %v851_v11 }
   0xe   :  { %736 = vadd.xlane.f32.xlu0 %v735_v14 }
   0xf   :  { %750 = vadd.xlane.f32.xlu1 %v749_v18 }
  0x12   :  { %1551 = vadd.xlane.f32.xlu0 %v1550_v19 }
  0x13   :  { %1558 = vadd.xlane.f32.xlu1 %v1557_v22 }
  0x93   :  { %v2043_v23 = vpop.xlane.xlu0 %33 }
  0x94   :  { %v2045_v24 = vpop.xlane.xlu1 %743  ;;  %v35_v25 = vmax.f32 %v2043_v23, 1e-16 }
  0x95   :  { %v857_v26 = vmax.f32 %v2045_v24, 1e-16 }
  0x96   :  { %1849 = vrsqrt.f32 %v35_v25 }
  0x97   :  { %v41_v27 = vpop.xlane.xlu0 %40  ;;  %1851 = vrsqrt.f32 %v857_v26 }
  0x98   :  { %v853_v28 = vpop.xlane.xlu1 %852  ;;  %v42_v29 = vmax.f32 %v41_v27, 1e-16 }
  0x99   :  { %v854_v30 = vmax.f32 %v853_v28, 1e-16 }
  0x9a   :  { %1853 = vrsqrt.f32 %v42_v29 }
  0x9b   :  { %1855 = vrsqrt.f32 %v854_v30 }
  0xa0   :  { %v1850_v31 = vpop.eup %1849 }
  0xa1   :  { %v1852_v32 = vpop.eup %1851  ;;  %v37_v33 = vmul.f32 %v1850_v31, %v1994_v0 }
  0xa2   :  { %v2052_v36 = vmul.f32 %v1852_v32, %v2002_v2 }
  0xa3   :  { %1751 = vmatpush3.xpose.msk.msra.mxu0 %vm31_vm0, %v37_v33  ;;  %v335_v34 = vmul.f32 %v37_v33, %v37_v33 }
  0xa4   :  { %v1854_v35 = vpop.eup %1853  ;;  %1760 = vmatprep.subr.mxu0 %v1953_v20 }
  0xa5   :  { %v1856_v37 = vpop.eup %1855  ;;  %v44_v38 = vmul.f32 %v1854_v35, %v26_v1  ;;  %v336_v39 = vsel %vm31_vm0, %v335_v34, 0.0 }
  0xa6   :  { %v856_v40 = vmul.f32 %v1856_v37, %v28_v6  ;;  %337 = vadd.xlane.f32.xlu0 %v336_v39  ;;  %1753 = vmatmul.mubr.msk.f32.vlgmr.msra.gmra.mrb[0].mxu0 %vm31_vm0, %v37_v33 }
  0xa7   :  { %1756 = vmatpush3.xpose.msk.msra.mxu1 %vm31_vm0, %v44_v38  ;;  %1761 = vmatpush3.xpose.msk.msra.mxu0 %vm31_vm0, %v37_v33  ;;  %v340_v41 = vmul.f32 %v44_v38, %v44_v38  ;;  %v2059_v42 = vmul.f32 %v44_v38, %v37_v33 }
  0xa8   :  { %1762 = vmatprep.mubr.msk.f32.mxu0 %vm1954_vm2, %v1953_v20  ;;  %1770 = vmatprep.subr.mxu0 %v1953_v20  ;;  %v2065_v43 = vmul.f32 %v2052_v36, %v856_v40  ;;  %v1150_v45 = vmul.f32 %v856_v40, %v856_v40 }
  0xa9   :  { %v341_v44 = vsel %vm31_vm0, %v340_v41, 0.0  ;;  %1765 = vmatprep.subr.mxu1 %v1953_v20 }
  0xaa   :  { %342 = vadd.xlane.f32.xlu1 %v341_v44  ;;  %1758 = vmatmul.mubr.msk.f32.vlgmr.msra.gmra.mrb[0].mxu1 %vm31_vm0, %v37_v33  ;;  %v1151_v46 = vsel %vm734_vm1, %v1150_v45, 0.0 }
  0xab   :  { %1763 = vmatmul.mubr.msk.f32.vlgmr.msra.gmra.mrb[2].mxu0 %vm31_vm0, %v44_v38  ;;  %1766 = vmatpush3.xpose.msk.msra.mxu1 %vm31_vm0, %v44_v38 }
  0xac   :  { %1771 = vmatpush3.xpose.msk.msra.mxu0 %vm31_vm0, %v2018_v12  ;;  %1767 = vmatprep.mubr.msk.f32.mxu1 %vm1954_vm2, %v1953_v20 }
  0xad   :  { %1772 = vmatprep.mubr.msk.f32.mxu0 %vm1954_vm2, %v1953_v20  ;;  %1775 = vmatprep.subr.mxu1 %v1953_v20 }
  0xae   :  { %1768 = vmatmul.mubr.msk.f32.vlgmr.msra.gmra.mrb[2].mxu1 %vm31_vm0, %v44_v38  ;;  %1780 = vmatprep.subr.mxu0 %v1953_v20 }
  0xaf   :  { %1773 = vmatmul.mubr.msk.f32.vlgmr.msra.gmra.mrb[4].mxu0 %vm31_vm0, %v2018_v12  ;;  %1776 = vmatpush3.xpose.msk.msra.mxu1 %vm31_vm0, %v2002_v2 }
  0xb0   :  { %1781 = vmatpush3.xpose.msk.msra.mxu0 %vm31_vm0, %v2018_v12  ;;  %1777 = vmatprep.mubr.msk.f32.mxu1 %vm1954_vm2, %v1953_v20 }
  0xb1   :  { %1782 = vmatprep.mubr.msk.f32.mxu0 %vm1954_vm2, %v1953_v20  ;;  %1785 = vmatprep.subr.mxu1 %v1953_v20 }
  0xb2   :  { %1778 = vmatmul.mubr.msk.f32.vlgmr.msra.gmra.mrb[4].mxu1 %vm31_vm0, %v2018_v12  ;;  %1790 = vmatprep.subr.mxu0 %v1953_v20 }
  0xb3   :  { %1783 = vmatmul.mubr.msk.f32.vlgmr.msra.gmra.mrb[6].mxu0 %vm31_vm0, %v2002_v2  ;;  %1786 = vmatpush3.xpose.msk.msra.mxu1 %vm31_vm0, %v2002_v2 }
  0xb4   :  { %1791 = vmatpush3.xpose.msk.msra.mxu0 %vm31_vm0, %v856_v40  ;;  %1787 = vmatprep.mubr.msk.f32.mxu1 %vm1954_vm2, %v1953_v20 }
  0xb5   :  { %1792 = vmatprep.mubr.msk.f32.mxu0 %vm1954_vm2, %v1953_v20  ;;  %1795 = vmatprep.subr.mxu1 %v1953_v20 }
  0xb6   :  { %1788 = vmatmul.mubr.msk.f32.vlgmr.msra.gmra.mrb[6].mxu1 %vm31_vm0, %v2002_v2  ;;  %1800 = vmatprep.subr.mxu0 %v1953_v20 }
  0xb7   :  { %1793 = vmatmul.mubr.msk.f32.vlgmr.msra.gmra.mrb[8].mxu0 %vm31_vm0, %v856_v40  ;;  %1796 = vmatpush3.xpose.msk.msra.mxu1 %vm31_vm0, %v2052_v36 }
  0xb8   :  { %1801 = vmatpush3.xpose.msk.msra.mxu0 %vm31_vm0, %v856_v40  ;;  %1797 = vmatprep.mubr.msk.f32.mxu1 %vm1954_vm2, %v1953_v20 }
  0xb9   :  { %1802 = vmatprep.mubr.msk.f32.mxu0 %vm1954_vm2, %v1953_v20  ;;  %1805 = vmatprep.subr.mxu1 %v1953_v20 }
  0xba   :  { %1798 = vmatmul.mubr.msk.f32.vlgmr.msra.gmra.mrb[8].mxu1 %vm31_vm0, %v856_v40  ;;  %1810 = vmatprep.subr.mxu0 %v1953_v20 }
  0xbb   :  { %1803 = vmatmul.mubr.msk.f32.vlgmr.msra.gmra.mrb[10].mxu0 %vm31_vm0, %v2052_v36  ;;  %1806 = vmatpush3.xpose.msk.msra.mxu1 %vm31_vm0, %v2052_v36 }
  0xbc   :  { %1811 = vmatpush3.xpose.msk.msra.mxu0 %vm31_vm0, %v1994_v0  ;;  %1152 = vadd.xlane.f32.xlu0 %v1151_v46 }
  0xbd   :  { %1807 = vmatprep.mubr.msk.f32.mxu1 %vm1954_vm2, %v1953_v20  ;;  %1812 = vmatprep.mubr.msk.f32.mxu0 %vm1954_vm2, %v1953_v20 }
  0xbe   :  { %1808 = vmatmul.mubr.msk.f32.vlgmr.msra.gmra.mrb[10].mxu1 %vm31_vm0, %v2052_v36  ;;  %1815 = vmatprep.subr.mxu1 %v1953_v20 }
  0xbf   :  { %1813 = vmatmul.mubr.msk.f32.vlgmr.msra.gmra.mrb[12].mxu0 %vm31_vm0, %v1994_v0  ;;  %1816 = vmatpush3.xpose.msk.msra.mxu1 %vm31_vm0, %v2026_v15 }
  0xc0   :  { %1817 = vmatprep.mubr.msk.f32.mxu1 %vm1954_vm2, %v1953_v20  ;;  %1820 = vmatprep.subr.mxu0 %v1953_v20 }
  0xc1   :  { %1821 = vmatpush3.xpose.msk.msra.mxu0 %vm31_vm0, %v1994_v0  ;;  %1822 = vmatprep.mubr.msk.f32.mxu0 %vm1954_vm2, %v1953_v20 }
  0xc2   :  { %1818 = vmatmul.mubr.msk.f32.vlgmr.msra.gmra.mrb[12].mxu1 %vm31_vm0, %v1994_v0  ;;  %1825 = vmatprep.subr.mxu1 %v1953_v20 }
  0xc3   :  { %1826 = vmatpush3.xpose.msk.msra.mxu1 %vm31_vm0, %v2026_v15  ;;  %1827 = vmatprep.mubr.msk.f32.mxu1 %vm1954_vm2, %v1953_v20 }
  0xc4   :  { %1823 = vmatmul.mubr.msk.f32.vlgmr.msra.gmra.mrb[14].mxu0 %vm31_vm0, %v2026_v15 }
  0xc6   :  { %1828 = vmatmul.mubr.msk.f32.vlgmr.msra.gmra.mrb[14].mxu1 %vm31_vm0, %v2026_v15 }
 0x179   :  { %v2155_v47 = vpop.f32.mrb[0].mxu0 }
 0x17a   :  { %v1754_v48 = vpop.f32.mrb[1].mxu0  ;;  %v2184_v45 = vmul.f32 1.4285715, %v2155_v47 }
 0x17d   :  { %v2157_v49 = vpop.f32.mrb[0].mxu1 }
 0x17e   :  { %v2159_v50 = vpop.f32.mrb[2].mxu0  ;;  %v1759_v51 = vpop.f32.mrb[1].mxu1 }
 0x17f   :  { %v1764_v52 = vpop.f32.mrb[3].mxu0 }
 0x181   :  { %v2161_v53 = vpop.f32.mrb[2].mxu1 }
 0x182   :  { %v504_v54 = vpop.f32.mrb[4].mxu0  ;;  %v1769_v55 = vpop.f32.mrb[3].mxu1 }
 0x183   :  { %v508_v56 = vmul.f32 1.25, %v504_v54  ;;  %v1774_v57 = vpop.f32.mrb[5].mxu0 }
 0x185   :  { %v509_v58 = vmul.f32 1.442695, %v508_v56  ;;  %v580_v59 = vpop.f32.mrb[4].mxu1 }
 0x186   :  { %v584_v60 = vmul.f32 1.25, %v580_v59  ;;  %v1779_v61 = vpop.f32.mrb[5].mxu1  ;;  %v653_v62 = vpop.f32.mrb[6].mxu0 }
 0x187   :  { %1857 = vpow2.f32 %v509_v58  ;;  %v657_v63 = vmul.f32 1.25, %v653_v62  ;;  %v1784_v0 = vpop.f32.mrb[7].mxu0  ;;  %v365_v58 = vmul.f32 1.442695, %v2184_v45  ;;  %v2194_v62 = vmul.f32 1.4285715, %v2159_v50 }
 0x188   :  { %v585_v1 = vmul.f32 1.442695, %v584_v60  ;;  %v2191_v60 = vmul.f32 1.4285715, %v2157_v49 }
 0x189   :  { %v658_v2 = vmul.f32 1.442695, %v657_v63  ;;  %v726_v3 = vpop.f32.mrb[6].mxu1  ;;  %v376_v49 = vmul.f32 1.442695, %v2194_v62 }
 0x18a   :  { %1859 = vpow2.f32 %v585_v1  ;;  %v730_v4 = vmul.f32 1.25, %v726_v3  ;;  %v1789_v5 = vpop.f32.mrb[7].mxu1  ;;  %v2163_v6 = vpop.f32.mrb[8].mxu0  ;;  %v370_v3 = vmul.f32 1.442695, %v2191_v60 }
 0x18b   :  { %1861 = vpow2.f32 %v658_v2  ;;  %v1794_v7 = vpop.f32.mrb[9].mxu0  ;;  %v2202_v5 = vmul.f32 1.4285715, %v2163_v6 }
 0x18c   :  { %v731_v8 = vmul.f32 1.442695, %v730_v4 }
 0x18d   :  { %v2165_v9 = vpop.f32.mrb[8].mxu1 }
 0x18e   :  { %v1074_v10 = vpop.f32.mrb[10].mxu0  ;;  %v1799_v11 = vpop.f32.mrb[9].mxu1  ;;  %1863 = vpow2.f32 %v731_v8 }
 0x18f   :  { %v2167_v12 = vmul.f32 1.4285715, %v1074_v10  ;;  %v1804_v13 = vpop.f32.mrb[11].mxu0  ;;  %v334_v11 = vmul.f32 1.4285715, %v2161_v53  ;;  %v1155_v53 = vmul.f32 %v2052_v36, %v2052_v36 }
 0x191   :  { %v1858_v14 = vpop.eup %1857  ;;  %v1145_v15 = vpop.f32.mrb[10].mxu1  ;;  %v2171_v16 = vsel %vm755_vm3, %v2167_v12, 0.0 }
 0x192   :  { %v2173_v17 = vmul.f32 1.4285715, %v1145_v15  ;;  %v1317_v18 = vpop.f32.mrb[12].mxu0  ;;  %v756_v19 = vsel %vm755_vm3, %v1858_v14, 0.0  ;;  %v1809_v20 = vpop.f32.mrb[11].mxu1  ;;  %v774_v21 = vmul.f32 %v1858_v14, %v1858_v14 }
 0x193   :  { %v1321_v22 = vmul.f32 1.25, %v1317_v18  ;;  %757 = vadd.xlane.f32.xlu0 %v756_v19  ;;  %v1814_v25 = vpop.f32.mrb[13].mxu0  ;;  %v1179_v14 = vmul.f32 1.442695, %v2202_v5  ;;  %v381_v19 = vmul.f32 1.442695, %v334_v11 }
 0x194   :  { %v1860_v26 = vpop.eup %1859  ;;  %v775_v27 = vsel %vm755_vm3, %v774_v21, 0.0  ;;  %v2179_v28 = vsel %vm755_vm3, %v2173_v17, 0.0  ;;  %v1007_v20 = vmul.f32 1.4285715, %v2165_v9 }
 0x195   :  { %v1862_v29 = vpop.eup %1861  ;;  %v1322_v30 = vmul.f32 1.442695, %v1321_v22  ;;  %v1393_v31 = vpop.f32.mrb[12].mxu1  ;;  %v759_v32 = vsel %vm755_vm3, %v1860_v26, 0.0  ;;  %v778_v33 = vmul.f32 %v1860_v26, %v1860_v26  ;;  %v1190_v22 = vmul.f32 1.442695, %v2167_v12 }
 0x196   :  { %v1397_v34 = vmul.f32 1.25, %v1393_v31  ;;  %760 = vadd.xlane.f32.xlu1 %v759_v32  ;;  %v1819_v35 = vpop.f32.mrb[13].mxu1  ;;  %v765_v40 = vsel %vm755_vm3, %v1862_v29, 0.0  ;;  %v787_v41 = vmul.f32 %v1862_v29, %v1862_v29  ;;  %v1184_v26 = vmul.f32 1.442695, %v1007_v20 }
 0x197   :  { %1865 = vpow2.f32 %v1322_v30  ;;  %776 = vadd.xlane.f32.xlu0 %v775_v27  ;;  %v1466_v37 = vpop.f32.mrb[14].mxu0  ;;  %v779_v46 = vsel %vm755_vm3, %v778_v33, 0.0  ;;  %v1156_v29 = vsel %vm734_vm1, %v1155_v53, 0.0  ;;  %v1195_v12 = vmul.f32 1.442695, %v2173_v17 }
 0x198   :  { %v1398_v38 = vmul.f32 1.442695, %v1397_v34  ;;  %v1470_v39 = vmul.f32 1.25, %v1466_v37  ;;  %v1824_v44 = vpop.f32.mrb[15].mxu0  ;;  %v1864_v51 = vpop.eup %1863  ;;  %v788_v57 = vsel %vm755_vm3, %v787_v41, 0.0 }
 0x199   :  { %v1539_v48 = vpop.f32.mrb[14].mxu1  ;;  %v768_v59 = vsel %vm755_vm3, %v1864_v51, 0.0  ;;  %v791_v47 = vmul.f32 %v1864_v51, %v1864_v51  ;;  %v358_v51 = vsel %vm350_vm4, %v2194_v62, 0.0 }
 0x19a   :  { %1867 = vpow2.f32 %v1398_v38  ;;  %v1471_v52 = vmul.f32 1.442695, %v1470_v39  ;;  %780 = vadd.xlane.f32.xlu1 %v779_v46  ;;  %v1543_v54 = vmul.f32 1.25, %v1539_v48  ;;  %v1829_v55 = vpop.f32.mrb[15].mxu1  ;;  %v351_v46 = vsel %vm350_vm4, %v2184_v45, 0.0 }
 0x19b   :  { %766 = vadd.xlane.f32.xlu0 %v765_v40  ;;  %v792_v63 = vsel %vm755_vm3, %v791_v47, 0.0  ;;  %v361_v55 = vsel %vm350_vm4, %v334_v11, 0.0  ;;  %v1168_v45 = vsel %vm755_vm3, %v1007_v20, 0.0 }
 0x19c   :  { %1869 = vpow2.f32 %v1471_v52  ;;  %v1544_v56 = vmul.f32 1.442695, %v1543_v54  ;;  %v354_v52 = vsel %vm350_vm4, %v2191_v60, 0.0  ;;  %v346_v54 = vsel %vm31_vm0, %v2059_v42, 0.0  ;;  %v737_v42 = vpop.xlane.xlu0 %736 }
 0x19e   :  { %1871 = vpow2.f32 %v1544_v56  ;;  %769 = vadd.xlane.f32.xlu1 %v768_v59  ;;  %v1165_v56 = vsel %vm755_vm3, %v2202_v5, 0.0  ;;  %v751_v59 = vpop.xlane.xlu1 %750 }
 0x19f   :  { %789 = vadd.xlane.f32.xlu0 %v788_v57  ;;  %1873 = vpow2.f32 %v365_v58  ;;  %v1161_v57 = vsel %vm734_vm1, %v2065_v43, 0.0  ;;  %v738_v58 = vmul.f32 1.25, %v737_v42  ;;  %v752_v60 = vmul.f32 1.25, %v751_v59 }
 0x1a0   :  { %1875 = vpow2.f32 %v370_v3  ;;  %v1552_v47 = vpop.xlane.xlu0 %1551 }
 0x1a1   :  { %v1866_v61 = vpop.eup %1865  ;;  %1877 = vpow2.f32 %v376_v49  ;;  %v753_v62 = vmul.f32 1.442695, %v752_v60 }
 0x1a2   :  { %v1563_v0 = vsel %vm350_vm4, %v1866_v61, 0.0  ;;  %793 = vadd.xlane.f32.xlu1 %v792_v63  ;;  %v1581_v1 = vmul.f32 %v1866_v61, %v1866_v61  ;;  %1879 = vpow2.f32 %v1179_v14  ;;  %v739_v61 = vmul.f32 1.442695, %v738_v58 }
 0x1a3   :  { %1564 = vadd.xlane.f32.xlu0 %v1563_v0  ;;  %1881 = vpow2.f32 %v381_v19  ;;  %v1559_v0 = vpop.xlane.xlu1 %1558  ;;  %v1553_v19 = vmul.f32 1.25, %v1552_v47 }
 0x1a4   :  { %v1868_v2 = vpop.eup %1867  ;;  %v1582_v4 = vsel %vm350_vm4, %v1581_v1, 0.0  ;;  %1883 = vpow2.f32 %v1190_v22  ;;  %v338_v63 = vpop.xlane.xlu0 %337  ;;  %v745_v1 = vmul.f32 1.25, %v2045_v24 }
 0x1a5   :  { %v1566_v50 = vsel %vm350_vm4, %v1868_v2, 0.0  ;;  %v1585_v7 = vmul.f32 %v1868_v2, %v1868_v2  ;;  %1885 = vpow2.f32 %v1184_v26 }
 0x1a6   :  { %v1870_v8 = vpop.eup %1869  ;;  %1567 = vadd.xlane.f32.xlu1 %v1566_v50  ;;  %1887 = vpow2.f32 %v1195_v12 }
 0x1a7   :  { %1583 = vadd.xlane.f32.xlu0 %v1582_v4  ;;  %v1572_v13 = vsel %vm350_vm4, %v1870_v8, 0.0  ;;  %v1586_v15 = vsel %vm350_vm4, %v1585_v7, 0.0  ;;  %v1594_v21 = vmul.f32 %v1870_v8, %v1870_v8  ;;  %1889 = vpow2.f32 %v739_v61  ;;  %v343_v2 = vpop.xlane.xlu1 %342 }
 0x1a8   :  { %v1872_v10 = vpop.eup %1871  ;;  %1891 = vpow2.f32 %v753_v62  ;;  %v1546_v4 = vmul.f32 1.25, %v2043_v23  ;;  %v1560_v8 = vmul.f32 1.25, %v1559_v0  ;;  %v2258_v42 = vmul.f32 1.4285715, %v343_v2 }
 0x1a9   :  { %v1874_v6 = vpop.eup %1873  ;;  %v1575_v18 = vsel %vm350_vm4, %v1872_v10, 0.0  ;;  %v1595_v27 = vsel %vm350_vm4, %v1594_v21, 0.0  ;;  %v1598_v31 = vmul.f32 %v1872_v10, %v1872_v10 }
 0x1aa   :  { %1587 = vadd.xlane.f32.xlu1 %v1586_v15  ;;  %v367_v25 = vsel %vm350_vm4, %v1874_v6, 0.0  ;;  %v1876_v30 = vpop.eup %1875  ;;  %v1547_v11 = vmul.f32 1.442695, %v1546_v4  ;;  %v1561_v6 = vmul.f32 1.442695, %v1560_v8 }
 0x1ab   :  { %1573 = vadd.xlane.f32.xlu0 %v1572_v13  ;;  %v1878_v9 = vpop.eup %1877  ;;  %v372_v36 = vsel %vm350_vm4, %v1876_v30, 0.0  ;;  %v1599_v34 = vsel %vm350_vm4, %v1598_v31, 0.0  ;;  %v396_v2 = vmul.f32 1.442695, %v2258_v42 }
 0x1ac   :  { %v378_v32 = vsel %vm350_vm4, %v1878_v9, 0.0  ;;  %v1880_v33 = vpop.eup %1879 }
 0x1ad   :  { %v1882_v35 = vpop.eup %1881  ;;  %v1181_v37 = vsel %vm755_vm3, %v1880_v33, 0.0 }
 0x1ae   :  { %1576 = vadd.xlane.f32.xlu1 %v1575_v18  ;;  %v1884_v38 = vpop.eup %1883  ;;  %v383_v39 = vsel %vm350_vm4, %v1882_v35, 0.0 }
 0x1af   :  { %368 = vadd.xlane.f32.xlu0 %v367_v25  ;;  %v1886_v17 = vpop.eup %1885  ;;  %v1192_v40 = vsel %vm755_vm3, %v1884_v38, 0.0 }
 0x1b0   :  { %v1186_v41 = vsel %vm755_vm3, %v1886_v17, 0.0  ;;  %v1888_v44 = vpop.eup %1887 }
 0x1b1   :  { %v1197_v48 = vsel %vm755_vm3, %v1888_v44, 0.0  ;;  %v1890_v43 = vpop.eup %1889 }
 0x1b2   :  { %1157 = vadd.xlane.f32.xlu1 %v1156_v29  ;;  %v2246_v7 = vpop.eup %1891  ;;  %v783_v18 = vmul.f32 %v1890_v43, %v1890_v43 }
 0x1b3   :  { %1596 = vadd.xlane.f32.xlu0 %v1595_v27  ;;  %v785_v25 = vmul.f32 %v2246_v7, %v2246_v7  ;;  %v1554_v27 = vmul.f32 1.442695, %v1553_v19  ;;  %v805_v17 = vmul.f32 -1.0, %v2246_v7 }
 0x1b6   :  { %373 = vadd.xlane.f32.xlu1 %v372_v36 }
 0x1b7   :  { %379 = vadd.xlane.f32.xlu0 %v378_v32 }
 0x1ba   :  { %1600 = vadd.xlane.f32.xlu1 %v1599_v34 }
 0x1bb   :  { %1182 = vadd.xlane.f32.xlu0 %v1181_v37 }
 0x1be   :  { %384 = vadd.xlane.f32.xlu1 %v383_v39 }
 0x1bf   :  { %1193 = vadd.xlane.f32.xlu0 %v1192_v40 }
 0x1c2   :  { %1187 = vadd.xlane.f32.xlu1 %v1186_v41 }
 0x1c3   :  { %352 = vadd.xlane.f32.xlu0 %v351_v46 }
 0x1c6   :  { %1198 = vadd.xlane.f32.xlu1 %v1197_v48 }
 0x1c7   :  { %359 = vadd.xlane.f32.xlu0 %v358_v51 }
 0x1ca   :  { %355 = vadd.xlane.f32.xlu1 %v354_v52 }
 0x1cb   :  { %347 = vadd.xlane.f32.xlu0 %v346_v54 }
 0x1ce   :  { %362 = vadd.xlane.f32.xlu1 %v361_v55 }
 0x1cf   :  { %1169 = vadd.xlane.f32.xlu0 %v1168_v45  ;;  %v2256_v45 = vmul.f32 1.4285715, %v338_v63 }
 0x1d2   :  { %1166 = vadd.xlane.f32.xlu1 %v1165_v56 }
 0x1d3   :  { %1176 = vadd.xlane.f32.xlu0 %v2179_v28  ;;  %v2243_v28 = vpop.xlane.xlu0 %1152 }
 0x1d6   :  { %1173 = vadd.xlane.f32.xlu1 %v2171_v16  ;;  %v746_v16 = vmul.f32 1.442695, %v745_v1 }
 0x1d8   :  { %1893 = vpow2.f32 %v746_v16  ;;  %v391_v16 = vmul.f32 1.442695, %v2256_v45 }
 0x1da   :  { %1162 = vadd.xlane.f32.xlu1 %v1161_v57 }
 0x1e2   :  { %v1894_v53 = vpop.eup %1893 }
 0x1e3   :  { %v796_v31 = vmul.f32 %v1894_v53, %v1894_v53 }
 0x220   :  { %v758_v3 = vpop.xlane.xlu0 %757 }
 0x223   :  { %v761_v49 = vpop.xlane.xlu1 %760 }
 0x224   :  { %v762_v5 = vadd.f32 %v761_v49, %v758_v3  ;;  %v777_v50 = vpop.xlane.xlu0 %776 }
 0x226   :  { %v763_v10 = vsub.f32 %v762_v5, %v1890_v43 }
 0x227   :  { %v781_v13 = vpop.xlane.xlu1 %780 }
 0x228   :  { %v764_v24 = vsub.f32 %v763_v10, %v2246_v7  ;;  %v782_v14 = vadd.f32 %v781_v13, %v777_v50  ;;  %v767_v15 = vpop.xlane.xlu0 %766 }
 0x22a   :  { %1895 = vrcp.f32 %v764_v24  ;;  %v784_v23 = vsub.f32 %v782_v14, %v783_v18 }
 0x22b   :  { %1897 = vpow2.f32 %v1547_v11  ;;  %v770_v20 = vpop.xlane.xlu1 %769 }
 0x22c   :  { %v771_v21 = vadd.f32 %v770_v20, %v767_v15  ;;  %v790_v22 = vpop.xlane.xlu0 %789  ;;  %1899 = vpow2.f32 %v1561_v6  ;;  %v786_v29 = vsub.f32 %v784_v23, %v785_v25  ;;  %v2267_v6 = vmul.f32 1.4285715, %v2243_v28 }
 0x22e   :  { %v772_v26 = vsub.f32 %v771_v21, %v1894_v53  ;;  %v799_v32 = vmul.f32 10.0, %v786_v29 }
 0x22f   :  { %v794_v30 = vpop.xlane.xlu1 %793 }
 0x230   :  { %v773_v9 = vsub.f32 %v772_v26, %v2246_v7  ;;  %v795_v12 = vadd.f32 %v794_v30, %v790_v22  ;;  %v1565_v36 = vpop.xlane.xlu0 %1564  ;;  %v1205_v30 = vmul.f32 1.442695, %v2267_v6 }
 0x232   :  { %1901 = vrcp.f32 %v773_v9  ;;  %v797_v33 = vsub.f32 %v795_v12, %v796_v31 }
 0x233   :  { %1903 = vpow2.f32 %v1554_v27  ;;  %v1568_v34 = vpop.xlane.xlu1 %1567 }
 0x234   :  { %v1896_v35 = vpop.eup %1895  ;;  %v1569_v37 = vadd.f32 %v1568_v34, %v1565_v36  ;;  %v1584_v38 = vpop.xlane.xlu0 %1583  ;;  %v798_v48 = vsub.f32 %v797_v33, %v785_v25 }
 0x235   :  { %v1898_v39 = vpop.eup %1897  ;;  %v801_v40 = vmul.f32 %v1896_v35, %v799_v32 }
 0x236   :  { %v1570_v41 = vsub.f32 %v1569_v37, %v1898_v39  ;;  %v2253_v44 = vpop.eup %1899  ;;  %v1590_v57 = vmul.f32 %v1898_v39, %v1898_v39  ;;  %v802_v59 = vmul.f32 10.0, %v798_v48 }
 0x237   :  { %v806_v46 = vadd.f32 %v805_v17, %v801_v40  ;;  %v1588_v51 = vpop.xlane.xlu1 %1587  ;;  %v1592_v63 = vmul.f32 %v2253_v44, %v2253_v44  ;;  %v1612_v23 = vmul.f32 -1.4, %v2253_v44 }
 0x238   :  { %v1571_v52 = vsub.f32 %v1570_v41, %v2253_v44  ;;  %v1589_v54 = vadd.f32 %v1588_v51, %v1584_v38  ;;  %v1574_v55 = vpop.xlane.xlu0 %1573 }
 0x239   :  { %v808_v56 = vmul.f32 1.1111112, %v806_v46 }
 0x23a   :  { %1905 = vrcp.f32 %v1571_v52  ;;  %v1591_v47 = vsub.f32 %v1589_v54, %v1590_v57 }
 0x23b   :  { %v811_v58 = vmax.f32 %v808_v56, 2.865048  ;;  %v1577_v60 = vpop.xlane.xlu1 %1576 }
 0x23c   :  { %v1902_v61 = vpop.eup %1901  ;;  %v1578_v62 = vadd.f32 %v1577_v60, %v1574_v55  ;;  %v369_v0 = vpop.xlane.xlu0 %368  ;;  %v1593_v5 = vsub.f32 %v1591_v47, %v1592_v63 }
 0x23d   :  { %v1904_v1 = vpop.eup %1903  ;;  %v813_v3 = vadd.f32 %v2246_v7, %v811_v58  ;;  %v804_v43 = vmul.f32 %v1902_v61, %v802_v59 }
 0x23e   :  { %v1579_v4 = vsub.f32 %v1578_v62, %v1904_v1  ;;  %v1606_v24 = vmul.f32 14.0, %v1593_v5  ;;  %v1603_v27 = vmul.f32 %v1904_v1, %v1904_v1 }
 0x23f   :  { %v809_v49 = vadd.f32 %v805_v17, %v804_v43  ;;  %v1158_v50 = vpop.xlane.xlu1 %1157  ;;  %1907 = vrcp.f32 %v813_v3 }
 0x240   :  { %v1597_v8 = vpop.xlane.xlu0 %1596  ;;  %1909 = vpow2.f32 %v391_v16  ;;  %v1580_v11 = vsub.f32 %v1579_v4, %v2253_v44  ;;  %v2271_v21 = vmul.f32 1.4285715, %v1158_v50 }
 0x241   :  { %v810_v10 = vmul.f32 1.1111112, %v809_v49  ;;  %1911 = vpow2.f32 %v396_v2 }
 0x242   :  { %1913 = vrcp.f32 %v1580_v11  ;;  %v1210_v12 = vmul.f32 1.442695, %v2271_v21 }
 0x243   :  { %v812_v13 = vmax.f32 %v810_v10, 2.865048  ;;  %v374_v14 = vpop.xlane.xlu1 %373 }
 0x244   :  { %v1906_v15 = vpop.eup %1905  ;;  %v380_v18 = vpop.xlane.xlu0 %379  ;;  %v375_v25 = vadd.f32 %v374_v14, %v369_v0 }
 0x245   :  { %v819_v19 = vadd.f32 %v2246_v7, %v812_v13  ;;  %v1608_v20 = vmul.f32 %v1906_v15, %v1606_v24 }
 0x247   :  { %1915 = vrcp.f32 %v819_v19  ;;  %v1613_v22 = vadd.f32 %v1612_v23, %v1608_v20  ;;  %v1601_v53 = vpop.xlane.xlu1 %1600 }
 0x248   :  { %v1602_v26 = vadd.f32 %v1601_v53, %v1597_v8  ;;  %v1183_v29 = vpop.xlane.xlu0 %1182  ;;  %1917 = vpow2.f32 %v1205_v30 }
 0x249   :  { %v1614_v28 = vmul.f32 1.1111112, %v1613_v22  ;;  %v1908_v9 = vpop.eup %1907  ;;  %1919 = vpow2.f32 %v1210_v12 }
 0x24a   :  { %v1604_v36 = vsub.f32 %v1602_v26, %v1603_v27  ;;  %v1910_v31 = vpop.eup %1909  ;;  %v815_v40 = vmul.f32 %v1908_v9, %v2246_v7 }
 0x24b   :  { %v1617_v32 = vmax.f32 %v1614_v28, 4.0110674  ;;  %v385_v33 = vpop.xlane.xlu1 %384  ;;  %v393_v34 = vsub.f32 %v375_v25, %v1910_v31  ;;  %v1912_v39 = vpop.eup %1911 }
 0x24c   :  { %v1605_v35 = vsub.f32 %v1604_v36, %v1592_v63  ;;  %v386_v37 = vadd.f32 %v385_v33, %v380_v18  ;;  %v1194_v38 = vpop.xlane.xlu0 %1193  ;;  %v1914_v48 = vpop.eup %1913 }
 0x24d   :  { %v1619_v17 = vadd.f32 %v2253_v44, %v1617_v32 }
 0x24e   :  { %v1609_v41 = vmul.f32 14.0, %v1605_v35  ;;  %v398_v46 = vsub.f32 %v386_v37, %v1912_v39 }
 0x24f   :  { %1921 = vrcp.f32 %v1619_v17  ;;  %v1188_v51 = vpop.xlane.xlu1 %1187 }
 0x250   :  { %1923 = vlog2.f32 %v393_v34  ;;  %v1611_v52 = vmul.f32 %v1914_v48, %v1609_v41  ;;  %v353_v54 = vpop.xlane.xlu0 %352  ;;  %v1189_v61 = vadd.f32 %v1188_v51, %v1183_v29 }
 0x251   :  { %v1916_v55 = vpop.eup %1915  ;;  %1925 = vlog2.f32 %v815_v40 }
 0x252   :  { %v1615_v56 = vadd.f32 %v1612_v23, %v1611_v52  ;;  %1927 = vlog2.f32 %v398_v46  ;;  %v821_v58 = vmul.f32 %v1916_v55, %v2246_v7  ;;  %v1918_v62 = vpop.eup %1917 }
 0x253   :  { %v1199_v57 = vpop.xlane.xlu1 %1198  ;;  %v1920_v16 = vpop.eup %1919  ;;  %v1207_v5 = vsub.f32 %v1189_v61, %v1918_v62 }
 0x254   :  { %v1616_v59 = vmul.f32 1.1111112, %v1615_v56  ;;  %v360_v47 = vpop.xlane.xlu0 %359  ;;  %v1200_v0 = vadd.f32 %v1199_v57, %v1194_v38  ;;  %1929 = vlog2.f32 %v821_v58 }
 0x256   :  { %v1618_v60 = vmax.f32 %v1616_v59, 4.0110674  ;;  %v1212_v8 = vsub.f32 %v1200_v0, %v1920_v16 }
 0x257   :  { %v356_v1 = vpop.xlane.xlu1 %355 }
 0x258   :  { %v1625_v3 = vadd.f32 %v2253_v44, %v1618_v60  ;;  %v357_v43 = vadd.f32 %v356_v1, %v353_v54  ;;  %v348_v63 = vpop.xlane.xlu0 %347 }
 0x259   :  { %v1922_v4 = vpop.eup %1921  ;;  %v349_v2 = vmul.f32 1.4285715, %v348_v63 }
 0x25a   :  { %v1924_v49 = vpop.eup %1923  ;;  %1931 = vrcp.f32 %v1625_v3  ;;  %v387_v7 = vsub.f32 %v357_v43, %v2256_v45  ;;  %v1621_v15 = vmul.f32 %v1922_v4, %v2253_v44 }
 0x25b   :  { %v1926_v50 = vpop.eup %1925  ;;  %v363_v10 = vpop.xlane.xlu1 %362  ;;  %v401_v14 = vmul.f32 0.8, %v349_v2  ;;  %v395_v19 = vmul.f32 0.6931472, %v1924_v49  ;;  %1933 = vlog2.f32 %v1207_v5 }
 0x25c   :  { %v1928_v11 = vpop.eup %1927  ;;  %v364_v13 = vadd.f32 %v363_v10, %v360_v47  ;;  %v388_v24 = vsub.f32 %v387_v7, %v349_v2  ;;  %v1170_v18 = vpop.xlane.xlu0 %1169  ;;  %1935 = vlog2.f32 %v1212_v8  ;;  %v817_v25 = vmul.f32 0.6931472, %v1926_v50 }
 0x25d   :  { %v400_v22 = vmul.f32 0.6931472, %v1928_v11  ;;  %v402_v26 = vsub.f32 %v395_v19, %v401_v14  ;;  %1937 = vlog2.f32 %v1621_v15 }
 0x25e   :  { %v389_v23 = vsub.f32 %v364_v13, %v2258_v42  ;;  %v403_v20 = vadd.f32 %v388_v24, %v349_v2  ;;  %v1930_v29 = vpop.eup %1929  ;;  %v818_v32 = vsub.f32 0.0, %v817_v25 }
 0x25f   :  { %v1167_v53 = vpop.xlane.xlu1 %1166  ;;  %v406_v31 = vsub.f32 %v400_v22, %v401_v14  ;;  %v823_v37 = vmul.f32 0.6931472, %v1930_v29 }
 0x260   :  { %v390_v45 = vsub.f32 %v389_v23, %v349_v2  ;;  %v404_v27 = vmul.f32 0.013333334, %v403_v20  ;;  %v1171_v9 = vadd.f32 %v1170_v18, %v1167_v53  ;;  %v1177_v12 = vpop.xlane.xlu0 %1176  ;;  %v826_v41 = vsel %vm825_vm6, %v818_v32, 0.0 }
 0x261   :  { %v824_v54 = vsub.f32 0.0, %v823_v37 }
 0x262   :  { %v405_v30 = vsub.f32 %v402_v26, %v404_v27  ;;  %v407_v28 = vadd.f32 %v390_v45, %v349_v2  ;;  %v1201_v17 = vsub.f32 %v1171_v9, %v2267_v6 }
 0x263   :  { %v1174_v36 = vpop.xlane.xlu1 %1173  ;;  %v836_v47 = vsel %vm825_vm6, %v824_v54, 0.0 }
 0x264   :  { %v1932_v42 = vpop.eup %1931  ;;  %v1178_v33 = vadd.f32 %v1177_v12, %v1174_v36  ;;  %v411_v34 = vsel %vm410_vm5, %v405_v30, 0.0  ;;  %v408_v35 = vmul.f32 0.013333334, %v407_v28 }
 0x265   :  { %412 = vadd.xlane.f32.xlu0 %v411_v34  ;;  %v1627_v38 = vmul.f32 %v1932_v42, %v2253_v44  ;;  %v1934_v46 = vpop.eup %1933 }
 0x266   :  { %v409_v39 = vsub.f32 %v406_v31, %v408_v35  ;;  %v1203_v48 = vsub.f32 %v1178_v33, %v2271_v21  ;;  %v1936_v55 = vpop.eup %1935  ;;  %v1209_v59 = vmul.f32 0.6931472, %v1934_v46 }
 0x267   :  { %v1163_v40 = vpop.xlane.xlu1 %1162  ;;  %1939 = vlog2.f32 %v1627_v38  ;;  %v1938_v56 = vpop.eup %1937  ;;  %v1214_v6 = vmul.f32 0.6931472, %v1936_v55 }
 0x268   :  { %v1164_v51 = vmul.f32 1.4285715, %v1163_v40  ;;  %v421_v52 = vsel %vm410_vm5, %v409_v39, 0.0  ;;  %v1623_v62 = vmul.f32 0.6931472, %v1938_v56 }
 0x269   :  { %422 = vadd.xlane.f32.xlu1 %v421_v52  ;;  %827 = vadd.xlane.f32.xlu0 %v826_v41 }
 0x26a   :  { %v1202_v57 = vsub.f32 %v1201_v17, %v1164_v51  ;;  %v1215_v44 = vmul.f32 0.8, %v1164_v51  ;;  %v1204_v58 = vsub.f32 %v1203_v48, %v1164_v51  ;;  %v1624_v49 = vsub.f32 0.0, %v1623_v62 }
 0x26c   :  { %v1217_v60 = vadd.f32 %v1202_v57, %v1164_v51  ;;  %v1221_v61 = vadd.f32 %v1204_v58, %v1164_v51  ;;  %v1216_v21 = vsub.f32 %v1209_v59, %v1215_v44  ;;  %v1220_v1 = vsub.f32 %v1214_v6, %v1215_v44 }
 0x26d   :  { %837 = vadd.xlane.f32.xlu1 %v836_v47  ;;  %v1631_v50 = vsel %vm410_vm5, %v1624_v49, 0.0 }
 0x26e   :  { %v1218_v0 = vmul.f32 0.018181818, %v1217_v60  ;;  %v1222_v16 = vmul.f32 0.018181818, %v1221_v61 }
 0x270   :  { %v1219_v3 = vsub.f32 %v1216_v21, %v1218_v0  ;;  %v1223_v43 = vsub.f32 %v1220_v1, %v1222_v16 }
 0x271   :  { %v1940_v63 = vpop.eup %1939 }
 0x272   :  { %v1224_v4 = vsel %vm825_vm6, %v1219_v3, 0.0  ;;  %v1234_v2 = vsel %vm825_vm6, %v1223_v43, 0.0  ;;  %v1629_v5 = vmul.f32 0.6931472, %v1940_v63 }
 0x273   :  { %1225 = vadd.xlane.f32.xlu0 %v1224_v4  ;;  %1235 = vadd.xlane.f32.xlu1 %v1234_v2 }
 0x274   :  { %v1630_v7 = vsub.f32 0.0, %v1629_v5 }
 0x276   :  { %v1641_v8 = vsel %vm410_vm5, %v1630_v7, 0.0 }
 0x277   :  { %1632 = vadd.xlane.f32.xlu0 %v1631_v50  ;;  %1642 = vadd.xlane.f32.xlu1 %v1641_v8 }
 0x2f2   :  { %v413_v10 = vpop.xlane.xlu0 %412 }
 0x2f3   :  { %v414_v11 = vrot.slane %v413_v10, 4 }
 0x2f5   :  { %v415_v13 = vadd.f32 %v414_v11, %v413_v10 }
 0x2f6   :  { %v423_v24 = vpop.xlane.xlu1 %422  ;;  %v828_v14 = vpop.xlane.xlu0 %827 }
 0x2f7   :  { %v416_v15 = vrot.slane %v415_v13, 2  ;;  %v424_v18 = vrot.slane %v423_v24, 4  ;;  %v829_v19 = vrot.slane %v828_v14, 4 }
 0x2f9   :  { %v425_v23 = vadd.f32 %v424_v18, %v423_v24  ;;  %v830_v20 = vadd.f32 %v829_v19, %v828_v14  ;;  %v417_v22 = vadd.f32 %v416_v15, %v415_v13 }
 0x2fa   :  { %v838_v53 = vpop.xlane.xlu1 %837 }
 0x2fb   :  { %v426_v25 = vrot.slane %v425_v23, 2  ;;  %v831_v45 = vrot.slane %v830_v20, 2  ;;  %v839_v26 = vrot.slane %v838_v53, 4  ;;  %v418_v27 = vrot.slane %v417_v22, 1 }
 0x2fd   :  { %v840_v29 = vadd.f32 %v839_v26, %v838_v53  ;;  %v419_v30 = vadd.f32 %v418_v27, %v417_v22  ;;  %v427_v28 = vadd.f32 %v426_v25, %v425_v23  ;;  %v832_v9 = vadd.f32 %v831_v45, %v830_v20 }
 0x2ff   :  { %v841_v12 = vrot.slane %v840_v29, 2  ;;  %1830 = vpush %v419_v30  ;;  %v428_v36 = vrot.slane %v427_v28, 1  ;;  %v833_v31 = vrot.slane %v832_v9, 1 }
 0x300   :  { %v1236_v32 = vpop.xlane.xlu1 %1235  ;;  %v1226_v42 = vpop.xlane.xlu0 %1225 }
 0x301   :  { %v1237_v33 = vrot.slane %v1236_v32, 4  ;;  %v1227_v34 = vrot.slane %v1226_v42, 4  ;;  %v429_v35 = vadd.f32 %v428_v36, %v427_v28  ;;  %v834_v37 = vadd.f32 %v833_v31, %v832_v9 }
 0x302   :  { %v842_v38 = vadd.f32 %v841_v12, %v840_v29 }
 0x303   :  { %v1238_v39 = vadd.f32 %v1237_v33, %v1236_v32  ;;  %v1228_v17 = vadd.f32 %v1227_v34, %v1226_v42  ;;  %1832 = vpush %v429_v35 }
 0x304   :  { %1834 = vpush %v834_v37  ;;  %v1643_v40 = vpop.xlane.xlu1 %1642  ;;  %v1633_v41 = vpop.xlane.xlu0 %1632  ;;  %v843_v46 = vrot.slane %v842_v38, 1 }
 0x305   :  { %v1239_v48 = vrot.slane %v1238_v39, 2  ;;  %v1229_v51 = vrot.slane %v1228_v17, 2  ;;  %v1644_v52 = vrot.slane %v1643_v40, 4  ;;  %v1634_v54 = vrot.slane %v1633_v41, 4 }
 0x306   :  { %v844_v55 = vadd.f32 %v843_v46, %v842_v38 }
 0x307   :  { %v1645_v56 = vadd.f32 %v1644_v52, %v1643_v40  ;;  %v1635_v57 = vadd.f32 %v1634_v54, %v1633_v41  ;;  %v1230_v44 = vadd.f32 %v1229_v51, %v1228_v17  ;;  %v1240_v58 = vadd.f32 %v1239_v48, %v1238_v39 }
 0x308   :  { %1836 = vpush %v844_v55 }
 0x309   :  { %v1646_v59 = vrot.slane %v1645_v56, 2  ;;  %v1636_v6 = vrot.slane %v1635_v57, 2  ;;  %v1231_v47 = vrot.slane %v1230_v44, 1  ;;  %v1241_v60 = vrot.slane %v1240_v58, 1 }
 0x30b   :  { %v1647_v61 = vadd.f32 %v1646_v59, %v1645_v56  ;;  %v1637_v62 = vadd.f32 %v1636_v6, %v1635_v57  ;;  %v1232_v21 = vadd.f32 %v1231_v47, %v1230_v44  ;;  %v1242_v0 = vadd.f32 %v1241_v60, %v1240_v58 }
 0x30d   :  { %1838 = vpush %v1232_v21  ;;  %v1638_v1 = vrot.slane %v1637_v62, 1  ;;  %v1648_v16 = vrot.slane %v1647_v61, 1 }
 0x30e   :  { %1840 = vpush %v1242_v0 }
 0x30f   :  { %v1639_v3 = vadd.f32 %v1638_v1, %v1637_v62  ;;  %v1649_v43 = vadd.f32 %v1648_v16, %v1647_v61 }
 0x311   :  { %1842 = vpush %v1639_v3 }
 0x312   :  { %1844 = vpush %v1649_v43 }
 0x330   :  { %s1831_s1 = spop %1830 }
 0x334   :  { %s1833_s3 = spop %1832 }
 0x335   :  { %s431_s29 = sadd.f32 %s1833_s3, %s1831_s1  ;;  %s1835_s7 = spop %1834 }
 0x337   :  { %s434_s30 = smul.f32 0.0625, %s431_s29 }
 0x339   :  { %1662 = sst [smem:[#allocation2]] %s434_s30  ;;  %s1837_s8 = spop %1836 }
 0x33a   :  { %s846_s9 = sadd.f32 %s1837_s8, %s1835_s7 }
 0x33c   :  { %s849_s10 = smul.f32 0.083333336, %s846_s9 }
 0x33e   :  { %s1839_s11 = spop %1838  ;;  %1664 = sst [smem:[#allocation2 + $0x1]] %s849_s10 }
 0x33f   :  { %s1841_s12 = spop %1840  ;;  %s1655_s14 = sadd.f32 %s849_s10, %s434_s30 }
 0x340   :  { %s1244_s13 = sadd.f32 %s1841_s12, %s1839_s11 }
 0x342   :  { %s1247_s15 = smul.f32 0.083333336, %s1244_s13  ;;  %s1843_s16 = spop %1842 }
 0x343   :  { %s1845_s17 = spop %1844 }
 0x344   :  { %s1656_s18 = sadd.f32 %s1655_s14, %s1247_s15 }
 0x345   :  { %1666 = sst [smem:[#allocation2 + $0x2]] %s1247_s15 }
 0x346   :  { %s1659_s19 = smul.f32 0.33333334, %s1656_s18  ;;  %s1651_s20 = sadd.f32 %s1845_s17, %s1843_s16 }
 0x348   :  { %1670 = sst [smem:[#allocation2 + $0x4]] %s1659_s19  ;;  %s1654_s21 = smul.f32 0.0625, %s1651_s20 }
 0x34a   :  { %s1660_s22 = sadd.f32 %s1659_s19, %s1654_s21 }
 0x34b   :  { %1668 = sst [smem:[#allocation2 + $0x3]] %s1654_s21 }
 0x34c   :  { %1672 = sst [smem:[#allocation2 + $0x5]] %s1660_s22 }
 0x34d   :  { %1950 = shalt.err (!%p1947_p2)
}
 0x34e   :  { %s1955_s5 = smov [#allocation2]  }
 0x34f   :  { %1680 = dma.smem_to_hbm %s1955_s5, 16, %s2311_s6, [#allocation3]  }
 0x350   :  { %1951 = dma.done.wait [#allocation3], 16  }
 0x351   :  { %1952 = vsyncadd [#allocation3], 4294967280 }
 0x352   :  { %1684 = sfence }
 0x353   :  { %1685 = vsyncpa [#allocation3], 1 }

</bundles_post_ra>
